<compile_context>
chip_gen: v7x
topology: tpu7x:2x2x1
jax: 0.10.0
libtpu: 0.0.40
codegen_flags: <defaults>
</compile_context>

<pallas_src>
from itertools import product

import jax
import jax.numpy as jnp
import numpy as np
from jax.experimental import pallas as pl
from jax.experimental.pallas import tpu as pltpu


def _round_up(x, m):
    return ((x + m - 1) // m) * m


def _make_sdf_kernel(ms, rest_strides, m_sub_pad, mx_sub_pad, mrest_pad, tk,
                     inv_scale, clip_sdf, scale_output):
    n = len(ms)
    assert n == 3, "SDFNetwork operates on 3-D points"

    def kernel(pose_ref, knots_ref, vt_ref, q_ref, out_ref):
        q_rows = [q_ref[a:a + 1, :] for a in range(n)]          # 3 x (1, tk) world coords

        sub_iota = jax.lax.broadcasted_iota(jnp.int32, (m_sub_pad, tk), 0)

        idx_l, idx_r, dist_l, dist_r = [], [], [], []
        denom = None
        for a in range(n):
            ma = ms[a]
            # --- SDFNetwork.forward preprocessing, fused (transform / scale / clamp) ---
            xw = (pose_ref[a, 0] * q_rows[0] + pose_ref[a, 1] * q_rows[1]
                  + pose_ref[a, 2] * q_rows[2] + pose_ref[a, 3])          # (1, tk)
            x = (jnp.clip(xw * inv_scale, -1.0, 1.0) + 1.0) * 0.5         # -> [0, 1]

            # --- bucketize: #knots strictly below x (== torch.bucketize right=False) ---
            p = knots_ref[a * m_sub_pad:(a + 1) * m_sub_pad, :]           # (m_sub_pad, 1)
            cnt = jnp.sum((p < x).astype(jnp.int32), axis=0, keepdims=True)
            ir = jnp.where(cnt >= ma, ma - 1, cnt)
            il = jnp.clip(ir - 1, 0, ma - 1)
            # gather p[il], p[ir] via one-hot over sublanes (mostly plain vreg adds)
            p_l = jnp.sum(jnp.where(sub_iota == il, p, 0.0), axis=0, keepdims=True)
            p_r = jnp.sum(jnp.where(sub_iota == ir, p, 0.0), axis=0, keepdims=True)
            dl = jnp.maximum(x - p_l, 0.0)
            dr = jnp.maximum(p_r - x, 0.0)
            bz = jnp.logical_and(dl == 0.0, dr == 0.0)
            dl = jnp.where(bz, 1.0, dl)
            dr = jnp.where(bz, 1.0, dr)
            idx_l.append(il)
            idx_r.append(ir)
            dist_l.append(dl)
            dist_r.append(dr)
            ov = dl + dr
            denom = ov if denom is None else denom * ov

        # --- combined (y, z) 4-corner one-hot (mrest_pad, tk): the MXU rhs operand ---
        rest_iota = jax.lax.broadcasted_iota(jnp.int32, (mrest_pad, tk), 0)
        w_yz = None
        for corner in product([0, 1], repeat=n - 1):                      # 2^(n-1) = 4
            flat = None
            w = None
            for j, onoff in enumerate(corner):
                a = j + 1
                ia = idx_r[a] if onoff == 1 else idx_l[a]
                wa = dist_l[a] if onoff == 1 else dist_r[a]
                contrib = ia * rest_strides[j]
                flat = contrib if flat is None else flat + contrib
                w = wa if w is None else w * wa
            term = jnp.where(rest_iota == flat, w, 0.0)
            w_yz = term if w_yz is None else w_yz + term                  # init from 1st corner

        # --- MXU contraction over the flattened y/z axis: (8, 128) @ (128, tk) ---
        t1 = jnp.dot(vt_ref[...], w_yz, preferred_element_type=jnp.float32,
                     precision=jax.lax.Precision.HIGHEST)                 # (mx_sub_pad, tk)

        # --- x axis finished with a tiny 2-corner one-hot and an 8-row reduce ---
        x_iota = jax.lax.broadcasted_iota(jnp.int32, (mx_sub_pad, tk), 0)
        w_x = (jnp.where(x_iota == idx_l[0], dist_r[0], 0.0)
               + jnp.where(x_iota == idx_r[0], dist_l[0], 0.0))           # (mx_sub_pad, tk)
        numer = jnp.sum(w_x * t1, axis=0, keepdims=True)                  # (1, tk)

        h = numer * pl.reciprocal(denom, approx=False)                    # exact reciprocal

        # --- SDFNetwork.forward postprocessing ---
        if clip_sdf is not None:
            h = jnp.clip(h, -clip_sdf, clip_sdf)
        out_ref[...] = h * scale_output

    return kernel


def sdf_network_forward(pose, scale, points, values, x_world, *,
                        clip_sdf=None, scale_output=1.0, tk=None):
    """Pallas forward pass of SDFNetwork (single pose, noise_std=None).

    pose:    (4, 4) object pose in world frame (sdf_map_pose).
    scale:   python float, SDFModel.scale.
    points:  list of 3 sorted 1-D knot arrays over [0, 1] (SDF grid axes).
    values:  (Mx, My, Mz) dense SDF value grid (stand-in for the tcnn model).
    x_world: (..., 3) query points in world frame.
    tk:      query-tile width (lanes); None -> adaptive (one tile per v7x TC for small K).
    Returns (K, 1) SDF values, K = prod(leading dims).
    """
    n = len(points)
    assert n == 3 and values.ndim == 3
    ms = tuple(int(p.shape[0]) for p in points)
    for a in range(n):
        assert ms[a] == values.shape[a]

    x_world = jnp.asarray(x_world, jnp.float32).reshape(-1, 3)
    K = int(x_world.shape[0])

    if tk is None:
        # one tile per TensorCore (v7x has 2 TCs) for small K; cap at 1024 lanes for big K
        num_cores = 2
        tk = min(1024, _round_up(max(1, -(-K // num_cores)), 128))
    assert tk % 128 == 0
    k_pad = _round_up(K, tk)

    m_sub_pad = _round_up(max(ms), 8)
    mx_sub_pad = _round_up(ms[0], 8)          # sublane dim of the MXU lhs (output rows)
    mrest = ms[1] * ms[2]
    mrest_pad = _round_up(mrest, 128)         # lane / contraction dim of the MXU lhs
    rest_strides = (ms[2], 1)

    # rows of T_obj^-1 (applied to homogeneous points), read as SMEM scalars in-kernel
    t_inv = jnp.linalg.inv(jnp.asarray(pose, jnp.float32))
    pose34 = t_inv[:3, :]

    # per-axis knot vectors stacked along sublanes; 1e30 pad never bucketizes / selects
    knots = jnp.full((n * m_sub_pad, 1), 1e30, jnp.float32)
    for a in range(n):
        knots = knots.at[a * m_sub_pad:a * m_sub_pad + ms[a], 0].set(
            jnp.asarray(points[a], jnp.float32))

    # value grid with the y/z axes flattened onto lanes: vt[ix, iy*Mz + iz] = values[ix, iy, iz]
    vt = jnp.zeros((mx_sub_pad, mrest_pad), jnp.float32)
    vt = vt.at[:ms[0], :mrest].set(
        jnp.asarray(values, jnp.float32).reshape(ms[0], mrest))

    # queries on lanes (lane-dense layout end to end)
    q_t = jnp.zeros((n, k_pad), jnp.float32)
    q_t = q_t.at[:, :K].set(x_world.T)

    kernel = _make_sdf_kernel(ms, rest_strides, m_sub_pad, mx_sub_pad, mrest_pad, tk,
                              1.0 / float(scale), clip_sdf, float(scale_output))

    cost = pl.CostEstimate(
        flops=int(k_pad * (2 * mx_sub_pad * mrest_pad + 10 * mrest_pad
                           + 12 * n * m_sub_pad + 80)),
        transcendentals=0,
        bytes_accessed=int(4 * (n * k_pad + k_pad + n * m_sub_pad
                                + mx_sub_pad * mrest_pad + 12)),
    )

    out = pl.pallas_call(
        kernel,
        out_shape=jax.ShapeDtypeStruct((1, k_pad), jnp.float32),
        grid=(k_pad // tk,),
        in_specs=[
            pl.BlockSpec(memory_space=pltpu.MemorySpace.SMEM),   # pose rows (scalar reads)
            pl.BlockSpec(memory_space=pltpu.MemorySpace.VMEM),   # knots: whole, single buffer
            pl.BlockSpec(memory_space=pltpu.MemorySpace.VMEM),   # value grid: whole, single buffer
            pl.BlockSpec((n, tk), lambda i: (0, i)),             # query tile
        ],
        out_specs=pl.BlockSpec((1, tk), lambda i: (0, i)),       # lane-dense output
        compiler_params=pltpu.CompilerParams(dimension_semantics=("parallel",)),
        cost_estimate=cost,
    )(pose34, knots, vt, q_t)
    return out[0, :K].reshape(K, 1)


def _reference_forward(pose, scale, points, values, x_world, clip_sdf, scale_output):
    """Pure-JAX mirror of SDFNetwork.forward with the grid-interp model."""
    t_inv = jnp.linalg.inv(jnp.asarray(pose, jnp.float32))
    x_world = jnp.asarray(x_world, jnp.float32).reshape(-1, 3)
    cols = [x_world[:, 0], x_world[:, 1], x_world[:, 2]]
    inv_scale = 1.0 / float(scale)
    query = []
    for a in range(3):
        xo = (t_inv[a, 0] * cols[0] + t_inv[a, 1] * cols[1]
              + t_inv[a, 2] * cols[2] + t_inv[a, 3])
        query.append((jnp.clip(xo * inv_scale, -1.0, 1.0) + 1.0) * 0.5)

    idx_l, idx_r, dist_l, dist_r, overalls = [], [], [], [], []
    for p, x in zip(points, query):
        m = p.shape[0]
        ir = jnp.searchsorted(p, x, side="left").astype(jnp.int32)
        ir = jnp.where(ir >= m, m - 1, ir)
        il = jnp.clip(ir - 1, 0, m - 1)
        dl = jnp.maximum(x - p[il], 0.0)
        dr = jnp.maximum(p[ir] - x, 0.0)
        bz = (dl == 0.0) & (dr == 0.0)
        dl = jnp.where(bz, 1.0, dl)
        dr = jnp.where(bz, 1.0, dr)
        idx_l.append(il)
        idx_r.append(ir)
        dist_l.append(dl)
        dist_r.append(dr)
        overalls.append(dl + dr)
    num = 0.0
    for indexer in product([0, 1], repeat=3):
        as_s = tuple((idx_r if o else idx_l)[a] for a, o in enumerate(indexer))
        ws = [(dist_l if o else dist_r)[a] for a, o in enumerate(indexer)]
        num = num + values[as_s] * jnp.prod(jnp.stack(ws), axis=0)
    den = jnp.prod(jnp.stack(overalls), axis=0)
    h = num / den
    if clip_sdf is not None:
        h = jnp.clip(h, -clip_sdf, clip_sdf)
    return h * scale_output


if __name__ == "__main__":
    key = jax.random.PRNGKey(0)
    kq, kv = jax.random.split(key, 2)

    # object pose in world frame (rigid transform), as SDFModel.update_pose_and_scale sets
    theta = 0.3
    c, s = float(np.cos(theta)), float(np.sin(theta))
    pose = jnp.array([[c, -s, 0.0, 0.10],
                      [s, c, 0.0, -0.20],
                      [0.0, 0.0, 1.0, 0.05],
                      [0.0, 0.0, 0.0, 1.0]], jnp.float32)
    scale = 0.8
    clip_sdf = 1.5
    scale_output = 0.7

    # dense SDF grid over the normalized [0,1]^3 cube (stand-in for tcnn hashgrid+MLP)
    ms = (8, 10, 12)
    points = [jnp.linspace(0.0, 1.0, m, dtype=jnp.float32) for m in ms]
    values = jax.random.normal(kv, ms, dtype=jnp.float32)

    # world-frame query points, partly outside the box to exercise the clamping branches
    K = 300
    x_world = jax.random.uniform(kq, (K, 3), minval=-1.5, maxval=1.5, dtype=jnp.float32)

    out = sdf_network_forward(pose, scale, points, values, x_world,
                              clip_sdf=clip_sdf, scale_output=scale_output)
    out = jax.block_until_ready(out)

    ref = _reference_forward(pose, scale, points, values, x_world, clip_sdf, scale_output)
    assert out.shape == (K, 1)
    np.testing.assert_allclose(np.asarray(out)[:, 0], np.asarray(ref),
                               rtol=1e-5, atol=1e-5)

    print("KERNEL_OK")
</pallas_src>

<mosaic_0001>
module attributes {stable_mosaic.version = 11 : i64} {
  func.func @kernel(%arg0: i32, %arg1: memref<3x4xf32, #tpu.memory_space<smem>>, %arg2: memref<48x1xf32, #tpu.memory_space<vmem>>, %arg3: memref<8x128xf32, #tpu.memory_space<vmem>>, %arg4: memref<3x256xf32, #tpu.memory_space<vmem>>, %arg5: memref<1x256xf32, #tpu.memory_space<vmem>>) attributes {dimension_semantics = [#tpu.dimension_semantics<parallel>], iteration_bounds = array<i64: 2>, scalar_prefetch = 0 : i64, scratch_operands = 0 : i64, tpu.core_type = #tpu.core_type<tc>, window_params = [{transform_indices = @transform_0, window_bounds = array<i64: 3, 4>}, {pipeline_mode = #tpu.pipeline_mode<synchronous>, transform_indices = @transform_1, window_bounds = array<i64: 48, 1>}, {pipeline_mode = #tpu.pipeline_mode<synchronous>, transform_indices = @transform_2, window_bounds = array<i64: 8, 128>}, {transform_indices = @transform_3, window_bounds = array<i64: 3, 256>}, {transform_indices = @transform_4, window_bounds = array<i64: 1, 256>}]} {
    %c0 = arith.constant 0 : index
    %c0_0 = arith.constant 0 : index
    %0 = vector.load %arg4[%c0, %c0_0] : memref<3x256xf32, #tpu.memory_space<vmem>>, vector<1x256xf32>
    %c1 = arith.constant 1 : index
    %c0_1 = arith.constant 0 : index
    %1 = vector.load %arg4[%c1, %c0_1] : memref<3x256xf32, #tpu.memory_space<vmem>>, vector<1x256xf32>
    %c2 = arith.constant 2 : index
    %c0_2 = arith.constant 0 : index
    %2 = vector.load %arg4[%c2, %c0_2] : memref<3x256xf32, #tpu.memory_space<vmem>>, vector<1x256xf32>
    %3 = tpu.iota {dimensions = array<i32: 0>} : vector<16x256xi32>
    %c0_3 = arith.constant 0 : index
    %c0_4 = arith.constant 0 : index
    %4 = memref.load %arg1[%c0_3, %c0_4] : memref<3x4xf32, #tpu.memory_space<smem>>
    %5 = vector.broadcast %4 : f32 to vector<1x256xf32>
    %6 = arith.mulf %5, %0 : vector<1x256xf32>
    %c0_5 = arith.constant 0 : index
    %c1_6 = arith.constant 1 : index
    %7 = memref.load %arg1[%c0_5, %c1_6] : memref<3x4xf32, #tpu.memory_space<smem>>
    %8 = vector.broadcast %7 : f32 to vector<1x256xf32>
    %9 = arith.mulf %8, %1 : vector<1x256xf32>
    %10 = arith.addf %6, %9 : vector<1x256xf32>
    %c0_7 = arith.constant 0 : index
    %c2_8 = arith.constant 2 : index
    %11 = memref.load %arg1[%c0_7, %c2_8] : memref<3x4xf32, #tpu.memory_space<smem>>
    %12 = vector.broadcast %11 : f32 to vector<1x256xf32>
    %13 = arith.mulf %12, %2 : vector<1x256xf32>
    %14 = arith.addf %10, %13 : vector<1x256xf32>
    %c0_9 = arith.constant 0 : index
    %c3 = arith.constant 3 : index
    %15 = memref.load %arg1[%c0_9, %c3] : memref<3x4xf32, #tpu.memory_space<smem>>
    %16 = vector.broadcast %15 : f32 to vector<1x256xf32>
    %17 = arith.addf %14, %16 : vector<1x256xf32>
    %cst = arith.constant 1.250000e+00 : f32
    %18 = vector.broadcast %cst : f32 to vector<1x256xf32>
    %19 = arith.mulf %17, %18 : vector<1x256xf32>
    %cst_10 = arith.constant -1.000000e+00 : f32
    %cst_11 = arith.constant 1.000000e+00 : f32
    %20 = vector.broadcast %cst_10 : f32 to vector<1x256xf32>
    %21 = arith.maximumf %20, %19 : vector<1x256xf32>
    %22 = vector.broadcast %cst_11 : f32 to vector<1x256xf32>
    %23 = arith.minimumf %22, %21 : vector<1x256xf32>
    %cst_12 = arith.constant 1.000000e+00 : f32
    %24 = vector.broadcast %cst_12 : f32 to vector<1x256xf32>
    %25 = arith.addf %23, %24 : vector<1x256xf32>
    %cst_13 = arith.constant 5.000000e-01 : f32
    %26 = vector.broadcast %cst_13 : f32 to vector<1x256xf32>
    %27 = arith.mulf %25, %26 : vector<1x256xf32>
    %c0_14 = arith.constant 0 : index
    %c0_15 = arith.constant 0 : index
    %28 = vector.load %arg2[%c0_14, %c0_15] : memref<48x1xf32, #tpu.memory_space<vmem>>, vector<16x1xf32>
    %29 = vector.broadcast %28 : vector<16x1xf32> to vector<16x256xf32>
    %30 = vector.broadcast %27 : vector<1x256xf32> to vector<16x256xf32>
    %31 = arith.cmpf olt, %29, %30 : vector<16x256xf32>
    %32 = arith.extui %31 : vector<16x256xi1> to vector<16x256xi32>
    %cst_16 = arith.constant dense<0> : vector<256xi32>
    %33 = vector.multi_reduction <add>, %32, %cst_16 [0] : vector<16x256xi32> to vector<256xi32>
    %34 = vector.shape_cast %33 : vector<256xi32> to vector<1x256xi32>
    %c8_i32 = arith.constant 8 : i32
    %35 = vector.broadcast %c8_i32 : i32 to vector<1x256xi32>
    %36 = arith.cmpi sge, %34, %35 : vector<1x256xi32>
    %c7_i32 = arith.constant 7 : i32
    %37 = vector.broadcast %c7_i32 : i32 to vector<1x256xi32>
    %38 = arith.select %36, %37, %34 : vector<1x256xi1>, vector<1x256xi32>
    %c1_i32 = arith.constant 1 : i32
    %39 = vector.broadcast %c1_i32 : i32 to vector<1x256xi32>
    %40 = arith.subi %38, %39 : vector<1x256xi32>
    %c0_i32 = arith.constant 0 : i32
    %c7_i32_17 = arith.constant 7 : i32
    %41 = vector.broadcast %c0_i32 : i32 to vector<1x256xi32>
    %42 = arith.maxsi %41, %40 : vector<1x256xi32>
    %43 = vector.broadcast %c7_i32_17 : i32 to vector<1x256xi32>
    %44 = arith.minsi %43, %42 : vector<1x256xi32>
    %45 = vector.broadcast %44 : vector<1x256xi32> to vector<16x256xi32>
    %46 = arith.cmpi eq, %3, %45 : vector<16x256xi32>
    %cst_18 = arith.constant 0.000000e+00 : f32
    %47 = vector.shape_cast %28 : vector<16x1xf32> to vector<16x1xf32>
    %48 = vector.broadcast %47 : vector<16x1xf32> to vector<16x256xf32>
    %49 = vector.broadcast %cst_18 : f32 to vector<16x256xf32>
    %50 = arith.select %46, %48, %49 : vector<16x256xi1>, vector<16x256xf32>
    %cst_19 = arith.constant dense<0.000000e+00> : vector<256xf32>
    %51 = vector.multi_reduction <add>, %50, %cst_19 [0] : vector<16x256xf32> to vector<256xf32>
    %52 = vector.shape_cast %51 : vector<256xf32> to vector<1x256xf32>
    %53 = vector.broadcast %38 : vector<1x256xi32> to vector<16x256xi32>
    %54 = arith.cmpi eq, %3, %53 : vector<16x256xi32>
    %cst_20 = arith.constant 0.000000e+00 : f32
    %55 = vector.shape_cast %28 : vector<16x1xf32> to vector<16x1xf32>
    %56 = vector.broadcast %55 : vector<16x1xf32> to vector<16x256xf32>
    %57 = vector.broadcast %cst_20 : f32 to vector<16x256xf32>
    %58 = arith.select %54, %56, %57 : vector<16x256xi1>, vector<16x256xf32>
    %cst_21 = arith.constant dense<0.000000e+00> : vector<256xf32>
    %59 = vector.multi_reduction <add>, %58, %cst_21 [0] : vector<16x256xf32> to vector<256xf32>
    %60 = vector.shape_cast %59 : vector<256xf32> to vector<1x256xf32>
    %61 = arith.subf %27, %52 : vector<1x256xf32>
    %cst_22 = arith.constant 0.000000e+00 : f32
    %62 = vector.broadcast %cst_22 : f32 to vector<1x256xf32>
    %63 = arith.maximumf %61, %62 : vector<1x256xf32>
    %64 = arith.subf %60, %27 : vector<1x256xf32>
    %cst_23 = arith.constant 0.000000e+00 : f32
    %65 = vector.broadcast %cst_23 : f32 to vector<1x256xf32>
    %66 = arith.maximumf %64, %65 : vector<1x256xf32>
    %cst_24 = arith.constant 0.000000e+00 : f32
    %67 = vector.broadcast %cst_24 : f32 to vector<1x256xf32>
    %68 = arith.cmpf oeq, %63, %67 : vector<1x256xf32>
    %cst_25 = arith.constant 0.000000e+00 : f32
    %69 = vector.broadcast %cst_25 : f32 to vector<1x256xf32>
    %70 = arith.cmpf oeq, %66, %69 : vector<1x256xf32>
    %71 = arith.andi %68, %70 : vector<1x256xi1>
    %cst_26 = arith.constant 1.000000e+00 : f32
    %72 = vector.broadcast %cst_26 : f32 to vector<1x256xf32>
    %73 = arith.select %71, %72, %63 : vector<1x256xi1>, vector<1x256xf32>
    %cst_27 = arith.constant 1.000000e+00 : f32
    %74 = vector.broadcast %cst_27 : f32 to vector<1x256xf32>
    %75 = arith.select %71, %74, %66 : vector<1x256xi1>, vector<1x256xf32>
    %76 = arith.addf %73, %75 : vector<1x256xf32>
    %c1_28 = arith.constant 1 : index
    %c0_29 = arith.constant 0 : index
    %77 = memref.load %arg1[%c1_28, %c0_29] : memref<3x4xf32, #tpu.memory_space<smem>>
    %78 = vector.broadcast %77 : f32 to vector<1x256xf32>
    %79 = arith.mulf %78, %0 : vector<1x256xf32>
    %c1_30 = arith.constant 1 : index
    %c1_31 = arith.constant 1 : index
    %80 = memref.load %arg1[%c1_30, %c1_31] : memref<3x4xf32, #tpu.memory_space<smem>>
    %81 = vector.broadcast %80 : f32 to vector<1x256xf32>
    %82 = arith.mulf %81, %1 : vector<1x256xf32>
    %83 = arith.addf %79, %82 : vector<1x256xf32>
    %c1_32 = arith.constant 1 : index
    %c2_33 = arith.constant 2 : index
    %84 = memref.load %arg1[%c1_32, %c2_33] : memref<3x4xf32, #tpu.memory_space<smem>>
    %85 = vector.broadcast %84 : f32 to vector<1x256xf32>
    %86 = arith.mulf %85, %2 : vector<1x256xf32>
    %87 = arith.addf %83, %86 : vector<1x256xf32>
    %c1_34 = arith.constant 1 : index
    %c3_35 = arith.constant 3 : index
    %88 = memref.load %arg1[%c1_34, %c3_35] : memref<3x4xf32, #tpu.memory_space<smem>>
    %89 = vector.broadcast %88 : f32 to vector<1x256xf32>
    %90 = arith.addf %87, %89 : vector<1x256xf32>
    %cst_36 = arith.constant 1.250000e+00 : f32
    %91 = vector.broadcast %cst_36 : f32 to vector<1x256xf32>
    %92 = arith.mulf %90, %91 : vector<1x256xf32>
    %cst_37 = arith.constant -1.000000e+00 : f32
    %cst_38 = arith.constant 1.000000e+00 : f32
    %93 = vector.broadcast %cst_37 : f32 to vector<1x256xf32>
    %94 = arith.maximumf %93, %92 : vector<1x256xf32>
    %95 = vector.broadcast %cst_38 : f32 to vector<1x256xf32>
    %96 = arith.minimumf %95, %94 : vector<1x256xf32>
    %cst_39 = arith.constant 1.000000e+00 : f32
    %97 = vector.broadcast %cst_39 : f32 to vector<1x256xf32>
    %98 = arith.addf %96, %97 : vector<1x256xf32>
    %cst_40 = arith.constant 5.000000e-01 : f32
    %99 = vector.broadcast %cst_40 : f32 to vector<1x256xf32>
    %100 = arith.mulf %98, %99 : vector<1x256xf32>
    %c16 = arith.constant 16 : index
    %c0_41 = arith.constant 0 : index
    %101 = vector.load %arg2[%c16, %c0_41] : memref<48x1xf32, #tpu.memory_space<vmem>>, vector<16x1xf32>
    %102 = vector.broadcast %101 : vector<16x1xf32> to vector<16x256xf32>
    %103 = vector.broadcast %100 : vector<1x256xf32> to vector<16x256xf32>
    %104 = arith.cmpf olt, %102, %103 : vector<16x256xf32>
    %105 = arith.extui %104 : vector<16x256xi1> to vector<16x256xi32>
    %cst_42 = arith.constant dense<0> : vector<256xi32>
    %106 = vector.multi_reduction <add>, %105, %cst_42 [0] : vector<16x256xi32> to vector<256xi32>
    %107 = vector.shape_cast %106 : vector<256xi32> to vector<1x256xi32>
    %c10_i32 = arith.constant 10 : i32
    %108 = vector.broadcast %c10_i32 : i32 to vector<1x256xi32>
    %109 = arith.cmpi sge, %107, %108 : vector<1x256xi32>
    %c9_i32 = arith.constant 9 : i32
    %110 = vector.broadcast %c9_i32 : i32 to vector<1x256xi32>
    %111 = arith.select %109, %110, %107 : vector<1x256xi1>, vector<1x256xi32>
    %c1_i32_43 = arith.constant 1 : i32
    %112 = vector.broadcast %c1_i32_43 : i32 to vector<1x256xi32>
    %113 = arith.subi %111, %112 : vector<1x256xi32>
    %c0_i32_44 = arith.constant 0 : i32
    %c9_i32_45 = arith.constant 9 : i32
    %114 = vector.broadcast %c0_i32_44 : i32 to vector<1x256xi32>
    %115 = arith.maxsi %114, %113 : vector<1x256xi32>
    %116 = vector.broadcast %c9_i32_45 : i32 to vector<1x256xi32>
    %117 = arith.minsi %116, %115 : vector<1x256xi32>
    %118 = vector.broadcast %117 : vector<1x256xi32> to vector<16x256xi32>
    %119 = arith.cmpi eq, %3, %118 : vector<16x256xi32>
    %cst_46 = arith.constant 0.000000e+00 : f32
    %120 = vector.shape_cast %101 : vector<16x1xf32> to vector<16x1xf32>
    %121 = vector.broadcast %120 : vector<16x1xf32> to vector<16x256xf32>
    %122 = vector.broadcast %cst_46 : f32 to vector<16x256xf32>
    %123 = arith.select %119, %121, %122 : vector<16x256xi1>, vector<16x256xf32>
    %cst_47 = arith.constant dense<0.000000e+00> : vector<256xf32>
    %124 = vector.multi_reduction <add>, %123, %cst_47 [0] : vector<16x256xf32> to vector<256xf32>
    %125 = vector.shape_cast %124 : vector<256xf32> to vector<1x256xf32>
    %126 = vector.broadcast %111 : vector<1x256xi32> to vector<16x256xi32>
    %127 = arith.cmpi eq, %3, %126 : vector<16x256xi32>
    %cst_48 = arith.constant 0.000000e+00 : f32
    %128 = vector.shape_cast %101 : vector<16x1xf32> to vector<16x1xf32>
    %129 = vector.broadcast %128 : vector<16x1xf32> to vector<16x256xf32>
    %130 = vector.broadcast %cst_48 : f32 to vector<16x256xf32>
    %131 = arith.select %127, %129, %130 : vector<16x256xi1>, vector<16x256xf32>
    %cst_49 = arith.constant dense<0.000000e+00> : vector<256xf32>
    %132 = vector.multi_reduction <add>, %131, %cst_49 [0] : vector<16x256xf32> to vector<256xf32>
    %133 = vector.shape_cast %132 : vector<256xf32> to vector<1x256xf32>
    %134 = arith.subf %100, %125 : vector<1x256xf32>
    %cst_50 = arith.constant 0.000000e+00 : f32
    %135 = vector.broadcast %cst_50 : f32 to vector<1x256xf32>
    %136 = arith.maximumf %134, %135 : vector<1x256xf32>
    %137 = arith.subf %133, %100 : vector<1x256xf32>
    %cst_51 = arith.constant 0.000000e+00 : f32
    %138 = vector.broadcast %cst_51 : f32 to vector<1x256xf32>
    %139 = arith.maximumf %137, %138 : vector<1x256xf32>
    %cst_52 = arith.constant 0.000000e+00 : f32
    %140 = vector.broadcast %cst_52 : f32 to vector<1x256xf32>
    %141 = arith.cmpf oeq, %136, %140 : vector<1x256xf32>
    %cst_53 = arith.constant 0.000000e+00 : f32
    %142 = vector.broadcast %cst_53 : f32 to vector<1x256xf32>
    %143 = arith.cmpf oeq, %139, %142 : vector<1x256xf32>
    %144 = arith.andi %141, %143 : vector<1x256xi1>
    %cst_54 = arith.constant 1.000000e+00 : f32
    %145 = vector.broadcast %cst_54 : f32 to vector<1x256xf32>
    %146 = arith.select %144, %145, %136 : vector<1x256xi1>, vector<1x256xf32>
    %cst_55 = arith.constant 1.000000e+00 : f32
    %147 = vector.broadcast %cst_55 : f32 to vector<1x256xf32>
    %148 = arith.select %144, %147, %139 : vector<1x256xi1>, vector<1x256xf32>
    %149 = arith.addf %146, %148 : vector<1x256xf32>
    %150 = arith.mulf %76, %149 : vector<1x256xf32>
    %c2_56 = arith.constant 2 : index
    %c0_57 = arith.constant 0 : index
    %151 = memref.load %arg1[%c2_56, %c0_57] : memref<3x4xf32, #tpu.memory_space<smem>>
    %152 = vector.broadcast %151 : f32 to vector<1x256xf32>
    %153 = arith.mulf %152, %0 : vector<1x256xf32>
    %c2_58 = arith.constant 2 : index
    %c1_59 = arith.constant 1 : index
    %154 = memref.load %arg1[%c2_58, %c1_59] : memref<3x4xf32, #tpu.memory_space<smem>>
    %155 = vector.broadcast %154 : f32 to vector<1x256xf32>
    %156 = arith.mulf %155, %1 : vector<1x256xf32>
    %157 = arith.addf %153, %156 : vector<1x256xf32>
    %c2_60 = arith.constant 2 : index
    %c2_61 = arith.constant 2 : index
    %158 = memref.load %arg1[%c2_60, %c2_61] : memref<3x4xf32, #tpu.memory_space<smem>>
    %159 = vector.broadcast %158 : f32 to vector<1x256xf32>
    %160 = arith.mulf %159, %2 : vector<1x256xf32>
    %161 = arith.addf %157, %160 : vector<1x256xf32>
    %c2_62 = arith.constant 2 : index
    %c3_63 = arith.constant 3 : index
    %162 = memref.load %arg1[%c2_62, %c3_63] : memref<3x4xf32, #tpu.memory_space<smem>>
    %163 = vector.broadcast %162 : f32 to vector<1x256xf32>
    %164 = arith.addf %161, %163 : vector<1x256xf32>
    %cst_64 = arith.constant 1.250000e+00 : f32
    %165 = vector.broadcast %cst_64 : f32 to vector<1x256xf32>
    %166 = arith.mulf %164, %165 : vector<1x256xf32>
    %cst_65 = arith.constant -1.000000e+00 : f32
    %cst_66 = arith.constant 1.000000e+00 : f32
    %167 = vector.broadcast %cst_65 : f32 to vector<1x256xf32>
    %168 = arith.maximumf %167, %166 : vector<1x256xf32>
    %169 = vector.broadcast %cst_66 : f32 to vector<1x256xf32>
    %170 = arith.minimumf %169, %168 : vector<1x256xf32>
    %cst_67 = arith.constant 1.000000e+00 : f32
    %171 = vector.broadcast %cst_67 : f32 to vector<1x256xf32>
    %172 = arith.addf %170, %171 : vector<1x256xf32>
    %cst_68 = arith.constant 5.000000e-01 : f32
    %173 = vector.broadcast %cst_68 : f32 to vector<1x256xf32>
    %174 = arith.mulf %172, %173 : vector<1x256xf32>
    %c32 = arith.constant 32 : index
    %c0_69 = arith.constant 0 : index
    %175 = vector.load %arg2[%c32, %c0_69] : memref<48x1xf32, #tpu.memory_space<vmem>>, vector<16x1xf32>
    %176 = vector.broadcast %175 : vector<16x1xf32> to vector<16x256xf32>
    %177 = vector.broadcast %174 : vector<1x256xf32> to vector<16x256xf32>
    %178 = arith.cmpf olt, %176, %177 : vector<16x256xf32>
    %179 = arith.extui %178 : vector<16x256xi1> to vector<16x256xi32>
    %cst_70 = arith.constant dense<0> : vector<256xi32>
    %180 = vector.multi_reduction <add>, %179, %cst_70 [0] : vector<16x256xi32> to vector<256xi32>
    %181 = vector.shape_cast %180 : vector<256xi32> to vector<1x256xi32>
    %c12_i32 = arith.constant 12 : i32
    %182 = vector.broadcast %c12_i32 : i32 to vector<1x256xi32>
    %183 = arith.cmpi sge, %181, %182 : vector<1x256xi32>
    %c11_i32 = arith.constant 11 : i32
    %184 = vector.broadcast %c11_i32 : i32 to vector<1x256xi32>
    %185 = arith.select %183, %184, %181 : vector<1x256xi1>, vector<1x256xi32>
    %c1_i32_71 = arith.constant 1 : i32
    %186 = vector.broadcast %c1_i32_71 : i32 to vector<1x256xi32>
    %187 = arith.subi %185, %186 : vector<1x256xi32>
    %c0_i32_72 = arith.constant 0 : i32
    %c11_i32_73 = arith.constant 11 : i32
    %188 = vector.broadcast %c0_i32_72 : i32 to vector<1x256xi32>
    %189 = arith.maxsi %188, %187 : vector<1x256xi32>
    %190 = vector.broadcast %c11_i32_73 : i32 to vector<1x256xi32>
    %191 = arith.minsi %190, %189 : vector<1x256xi32>
    %192 = vector.broadcast %191 : vector<1x256xi32> to vector<16x256xi32>
    %193 = arith.cmpi eq, %3, %192 : vector<16x256xi32>
    %cst_74 = arith.constant 0.000000e+00 : f32
    %194 = vector.shape_cast %175 : vector<16x1xf32> to vector<16x1xf32>
    %195 = vector.broadcast %194 : vector<16x1xf32> to vector<16x256xf32>
    %196 = vector.broadcast %cst_74 : f32 to vector<16x256xf32>
    %197 = arith.select %193, %195, %196 : vector<16x256xi1>, vector<16x256xf32>
    %cst_75 = arith.constant dense<0.000000e+00> : vector<256xf32>
    %198 = vector.multi_reduction <add>, %197, %cst_75 [0] : vector<16x256xf32> to vector<256xf32>
    %199 = vector.shape_cast %198 : vector<256xf32> to vector<1x256xf32>
    %200 = vector.broadcast %185 : vector<1x256xi32> to vector<16x256xi32>
    %201 = arith.cmpi eq, %3, %200 : vector<16x256xi32>
    %cst_76 = arith.constant 0.000000e+00 : f32
    %202 = vector.shape_cast %175 : vector<16x1xf32> to vector<16x1xf32>
    %203 = vector.broadcast %202 : vector<16x1xf32> to vector<16x256xf32>
    %204 = vector.broadcast %cst_76 : f32 to vector<16x256xf32>
    %205 = arith.select %201, %203, %204 : vector<16x256xi1>, vector<16x256xf32>
    %cst_77 = arith.constant dense<0.000000e+00> : vector<256xf32>
    %206 = vector.multi_reduction <add>, %205, %cst_77 [0] : vector<16x256xf32> to vector<256xf32>
    %207 = vector.shape_cast %206 : vector<256xf32> to vector<1x256xf32>
    %208 = arith.subf %174, %199 : vector<1x256xf32>
    %cst_78 = arith.constant 0.000000e+00 : f32
    %209 = vector.broadcast %cst_78 : f32 to vector<1x256xf32>
    %210 = arith.maximumf %208, %209 : vector<1x256xf32>
    %211 = arith.subf %207, %174 : vector<1x256xf32>
    %cst_79 = arith.constant 0.000000e+00 : f32
    %212 = vector.broadcast %cst_79 : f32 to vector<1x256xf32>
    %213 = arith.maximumf %211, %212 : vector<1x256xf32>
    %cst_80 = arith.constant 0.000000e+00 : f32
    %214 = vector.broadcast %cst_80 : f32 to vector<1x256xf32>
    %215 = arith.cmpf oeq, %210, %214 : vector<1x256xf32>
    %cst_81 = arith.constant 0.000000e+00 : f32
    %216 = vector.broadcast %cst_81 : f32 to vector<1x256xf32>
    %217 = arith.cmpf oeq, %213, %216 : vector<1x256xf32>
    %218 = arith.andi %215, %217 : vector<1x256xi1>
    %cst_82 = arith.constant 1.000000e+00 : f32
    %219 = vector.broadcast %cst_82 : f32 to vector<1x256xf32>
    %220 = arith.select %218, %219, %210 : vector<1x256xi1>, vector<1x256xf32>
    %cst_83 = arith.constant 1.000000e+00 : f32
    %221 = vector.broadcast %cst_83 : f32 to vector<1x256xf32>
    %222 = arith.select %218, %221, %213 : vector<1x256xi1>, vector<1x256xf32>
    %223 = arith.addf %220, %222 : vector<1x256xf32>
    %224 = arith.mulf %150, %223 : vector<1x256xf32>
    %225 = tpu.iota {dimensions = array<i32: 0>} : vector<128x256xi32>
    %c12_i32_84 = arith.constant 12 : i32
    %226 = vector.broadcast %c12_i32_84 : i32 to vector<1x256xi32>
    %227 = arith.muli %117, %226 : vector<1x256xi32>
    %c1_i32_85 = arith.constant 1 : i32
    %228 = vector.broadcast %c1_i32_85 : i32 to vector<1x256xi32>
    %229 = arith.muli %191, %228 : vector<1x256xi32>
    %230 = arith.addi %227, %229 : vector<1x256xi32>
    %231 = arith.mulf %148, %222 : vector<1x256xf32>
    %232 = vector.broadcast %230 : vector<1x256xi32> to vector<128x256xi32>
    %233 = arith.cmpi eq, %225, %232 : vector<128x256xi32>
    %cst_86 = arith.constant 0.000000e+00 : f32
    %234 = vector.shape_cast %231 : vector<1x256xf32> to vector<1x256xf32>
    %235 = vector.broadcast %234 : vector<1x256xf32> to vector<128x256xf32>
    %236 = vector.broadcast %cst_86 : f32 to vector<128x256xf32>
    %237 = arith.select %233, %235, %236 : vector<128x256xi1>, vector<128x256xf32>
    %c12_i32_87 = arith.constant 12 : i32
    %238 = vector.broadcast %c12_i32_87 : i32 to vector<1x256xi32>
    %239 = arith.muli %117, %238 : vector<1x256xi32>
    %c1_i32_88 = arith.constant 1 : i32
    %240 = vector.broadcast %c1_i32_88 : i32 to vector<1x256xi32>
    %241 = arith.muli %185, %240 : vector<1x256xi32>
    %242 = arith.addi %239, %241 : vector<1x256xi32>
    %243 = arith.mulf %148, %220 : vector<1x256xf32>
    %244 = vector.broadcast %242 : vector<1x256xi32> to vector<128x256xi32>
    %245 = arith.cmpi eq, %225, %244 : vector<128x256xi32>
    %cst_89 = arith.constant 0.000000e+00 : f32
    %246 = vector.shape_cast %243 : vector<1x256xf32> to vector<1x256xf32>
    %247 = vector.broadcast %246 : vector<1x256xf32> to vector<128x256xf32>
    %248 = vector.broadcast %cst_89 : f32 to vector<128x256xf32>
    %249 = arith.select %245, %247, %248 : vector<128x256xi1>, vector<128x256xf32>
    %250 = arith.addf %237, %249 : vector<128x256xf32>
    %c12_i32_90 = arith.constant 12 : i32
    %251 = vector.broadcast %c12_i32_90 : i32 to vector<1x256xi32>
    %252 = arith.muli %111, %251 : vector<1x256xi32>
    %c1_i32_91 = arith.constant 1 : i32
    %253 = vector.broadcast %c1_i32_91 : i32 to vector<1x256xi32>
    %254 = arith.muli %191, %253 : vector<1x256xi32>
    %255 = arith.addi %252, %254 : vector<1x256xi32>
    %256 = arith.mulf %146, %222 : vector<1x256xf32>
    %257 = vector.broadcast %255 : vector<1x256xi32> to vector<128x256xi32>
    %258 = arith.cmpi eq, %225, %257 : vector<128x256xi32>
    %cst_92 = arith.constant 0.000000e+00 : f32
    %259 = vector.shape_cast %256 : vector<1x256xf32> to vector<1x256xf32>
    %260 = vector.broadcast %259 : vector<1x256xf32> to vector<128x256xf32>
    %261 = vector.broadcast %cst_92 : f32 to vector<128x256xf32>
    %262 = arith.select %258, %260, %261 : vector<128x256xi1>, vector<128x256xf32>
    %263 = arith.addf %250, %262 : vector<128x256xf32>
    %c12_i32_93 = arith.constant 12 : i32
    %264 = vector.broadcast %c12_i32_93 : i32 to vector<1x256xi32>
    %265 = arith.muli %111, %264 : vector<1x256xi32>
    %c1_i32_94 = arith.constant 1 : i32
    %266 = vector.broadcast %c1_i32_94 : i32 to vector<1x256xi32>
    %267 = arith.muli %185, %266 : vector<1x256xi32>
    %268 = arith.addi %265, %267 : vector<1x256xi32>
    %269 = arith.mulf %146, %220 : vector<1x256xf32>
    %270 = vector.broadcast %268 : vector<1x256xi32> to vector<128x256xi32>
    %271 = arith.cmpi eq, %225, %270 : vector<128x256xi32>
    %cst_95 = arith.constant 0.000000e+00 : f32
    %272 = vector.shape_cast %269 : vector<1x256xf32> to vector<1x256xf32>
    %273 = vector.broadcast %272 : vector<1x256xf32> to vector<128x256xf32>
    %274 = vector.broadcast %cst_95 : f32 to vector<128x256xf32>
    %275 = arith.select %271, %273, %274 : vector<128x256xi1>, vector<128x256xf32>
    %276 = arith.addf %263, %275 : vector<128x256xf32>
    %c0_96 = arith.constant 0 : index
    %c0_97 = arith.constant 0 : index
    %277 = vector.load %arg3[%c0_96, %c0_97] : memref<8x128xf32, #tpu.memory_space<vmem>>, vector<8x128xf32>
    %cst_98 = arith.constant dense<0.000000e+00> : vector<8x256xf32>
    %278 = tpu.matmul %277, %276, %cst_98 {dimension_numbers = #tpu.dot_dimension_numbers<[1], [0], [0], [1], [0, 0, 1, 1], [], []>, precision = #tpu.contract_precision<fp32>} : vector<8x128xf32>, vector<128x256xf32>, vector<8x256xf32> -> vector<8x256xf32>
    %279 = tpu.iota {dimensions = array<i32: 0>} : vector<8x256xi32>
    %280 = vector.broadcast %44 : vector<1x256xi32> to vector<8x256xi32>
    %281 = arith.cmpi eq, %279, %280 : vector<8x256xi32>
    %cst_99 = arith.constant 0.000000e+00 : f32
    %282 = vector.shape_cast %75 : vector<1x256xf32> to vector<1x256xf32>
    %283 = vector.broadcast %282 : vector<1x256xf32> to vector<8x256xf32>
    %284 = vector.broadcast %cst_99 : f32 to vector<8x256xf32>
    %285 = arith.select %281, %283, %284 : vector<8x256xi1>, vector<8x256xf32>
    %286 = vector.broadcast %38 : vector<1x256xi32> to vector<8x256xi32>
    %287 = arith.cmpi eq, %279, %286 : vector<8x256xi32>
    %cst_100 = arith.constant 0.000000e+00 : f32
    %288 = vector.shape_cast %73 : vector<1x256xf32> to vector<1x256xf32>
    %289 = vector.broadcast %288 : vector<1x256xf32> to vector<8x256xf32>
    %290 = vector.broadcast %cst_100 : f32 to vector<8x256xf32>
    %291 = arith.select %287, %289, %290 : vector<8x256xi1>, vector<8x256xf32>
    %292 = arith.addf %285, %291 : vector<8x256xf32>
    %293 = arith.mulf %292, %278 : vector<8x256xf32>
    %cst_101 = arith.constant dense<0.000000e+00> : vector<256xf32>
    %294 = vector.multi_reduction <add>, %293, %cst_101 [0] : vector<8x256xf32> to vector<256xf32>
    %295 = vector.shape_cast %294 : vector<256xf32> to vector<1x256xf32>
    %296 = tpu.reciprocal %224 : vector<1x256xf32> -> vector<1x256xf32>
    %297 = arith.mulf %295, %296 : vector<1x256xf32>
    %cst_102 = arith.constant -1.500000e+00 : f32
    %cst_103 = arith.constant 1.500000e+00 : f32
    %298 = vector.broadcast %cst_102 : f32 to vector<1x256xf32>
    %299 = arith.maximumf %298, %297 : vector<1x256xf32>
    %300 = vector.broadcast %cst_103 : f32 to vector<1x256xf32>
    %301 = arith.minimumf %300, %299 : vector<1x256xf32>
    %cst_104 = arith.constant 0.699999988 : f32
    %302 = vector.broadcast %cst_104 : f32 to vector<1x256xf32>
    %303 = arith.mulf %301, %302 : vector<1x256xf32>
    %c0_105 = arith.constant 0 : index
    %c0_106 = arith.constant 0 : index
    %304 = vector.load %arg5[%c0_105, %c0_106] : memref<1x256xf32, #tpu.memory_space<vmem>>, vector<1x256xf32>
    tpu.vector_store %arg5[%c0_105, %c0_106], %303 {strides = array<i32>} : memref<1x256xf32, #tpu.memory_space<vmem>>, vector<1x256xf32>,
    return
  }
  func.func @transform_0(%arg0: i32) -> (i32, i32) {
    %c0_i32 = arith.constant 0 : i32
    %c0_i32_0 = arith.constant 0 : i32
    %c0_i32_1 = arith.constant 0 : i32
    return %c0_i32, %c0_i32_0 : i32, i32
  }
  func.func @transform_1(%arg0: i32) -> (i32, i32) {
    %c0_i32 = arith.constant 0 : i32
    %c0_i32_0 = arith.constant 0 : i32
    %c0_i32_1 = arith.constant 0 : i32
    return %c0_i32, %c0_i32_0 : i32, i32
  }
  func.func @transform_2(%arg0: i32) -> (i32, i32) {
    %c0_i32 = arith.constant 0 : i32
    %c0_i32_0 = arith.constant 0 : i32
    %c0_i32_1 = arith.constant 0 : i32
    return %c0_i32, %c0_i32_0 : i32, i32
  }
  func.func @transform_3(%arg0: i32) -> (i32, i32) {
    %c0_i32 = arith.constant 0 : i32
    %c0_i32_0 = arith.constant 0 : i32
    return %c0_i32, %arg0 : i32, i32
  }
  func.func @transform_4(%arg0: i32) -> (i32, i32) {
    %c0_i32 = arith.constant 0 : i32
    %c0_i32_0 = arith.constant 0 : i32
    return %c0_i32, %arg0 : i32, i32
  }
}

</mosaic_0001>

<bundles_post_ra>
// kernel: tpu_custom_call.1
= control target key start
LH: loop header
LB: loop body
LE: loop exit
PB: predicated region body
PF: predicated region fallthrough
CT: control target
= control target key end

     0   :  { %9 = vsyncpa [#allocation4], 0  ;;  %s3874_s0 = inlined_call_operand.vmem [shape: f32[3,4], index: 0, kind: input, shape index: {}]   ;;  %s3875_s1 = inlined_call_operand.vmem [shape: f32[48,1], index: 1, kind: input, shape index: {}]   ;;  %s3876_s2 = inlined_call_operand.vmem [shape: f32[8,128], index: 2, kind: input, shape index: {}]   ;;  %s3877_s3 = inlined_call_operand.vmem [shape: f32[3,512], index: 3, kind: input, shape index: {}]   ;;  %s3878_s4 = inlined_call_operand.hbm [shape: f32[1,512], index: 4, kind: output, shape index: {}]  }
   0x1   :  { %10 = vsyncpa [#allocation3], 0 }
   0x2   :  { %12 = vsyncpa [#allocation3 + $0x1], 0  ;;  %s2654_s15 = smov 0   ;;  %s2656_s16 = smov 0  }
   0x3   :  { %s2658_s17 = smov 0   ;;  %s2660_s18 = smov 0  }
   0x4 LB: > { %s2675_s19 = sadd.s32 4294967295, %s2622_s18   ;;  %s2243_s20 = sadd.s32 4294967294, %s2622_s18   ;;  %s2622_s18 = sphi %s2660_s18, %s3968_s18   ;;  %s2618_s17 = sphi %s2658_s17, %s3967_s17   ;;  %s2614_s16 = sphi %s2656_s16, %s3966_s16   ;;  %s2610_s15 = sphi %s2654_s15, %s3965_s15  }
   0x5   : > { %s2679_s21 = sadd.s32 1, %s2622_s18   ;;  %s114_s22 = sadd.s32 1, %s2618_s17 }
   0x6   : > { %s111_s23 = ssub.s32 %s2622_s18, %s2679_s21  ;;  %p124_p0 = scmp.ne.s32.totalorder %s2618_s17, %s2614_s16 }
   0x7   : > { %p112_p1 = scmp.eq.s32.totalorder %s111_s23, 0  ;;  %p125_p2 = scmp.eq.s32.totalorder %s2675_s19, 1 }
   0x8   : > { %p130_p3 = scmp.ne.s32.totalorder %s2614_s16, %s2610_s15  ;;  %p131_p4 = scmp.eq.s32.totalorder %s2243_s20, 1 }
   0x9   : > { %s2690_s24 = scalar_select %p112_p1, %s2618_s17, %s114_s22  }
   0xa   : > { %p2692_p5 = por %p125_p2, %p124_p0  ;;  %p2696_p6 = por %p131_p4, %p130_p3 }
   0xb   : > { %p2244_p7 = scmp.ge.s32.totalorder %s2622_s18, 1  ;;  %p138_p8 = scmp.lt.s32.totalorder %s2622_s18, 3 }
   0xc   : > { %p2498_p9 = scmp.eq.s32.totalorder %s2675_s19, 0  ;;  %s151_s30 = sshll.u32 %s3874_s0, 4  ;;  %s152_s30 = int_to_ptr.vmem [resolvable:$true] %s151_s30 }
   0xd   : > { %p2703_p10 = pnand %p2244_p7, %p138_p8  ;;  %s2541_s5 = scalar_lea.vmem %s152_s30, 64 }
   0xe   : > { %p2542_p13 = scmp.ne.s32.totalorder %s152_s30, %s2541_s5  ;;  %p2549_p3 = scmp.lt.s32.totalorder %s152_s30, %s152_s30 }
   0xf   : > { %p2490_p11 = pneg %p2703_p10  ;;  %p2550_p4 = scmp.lt.s32.totalorder %s2541_s5, %s2541_s5 }
  0x11   : > { %p2491_p12 = pnand %p2498_p9, %p2490_p11  ;;  %p2551_p7 = por %p2550_p4, %p2549_p3 }
  0x13   : > { %p2543_p0 = pneg %p2491_p12 }
  0x15   : > { %p2544_p1 = pnand %p2543_p0, %p2542_p13 }
  0x17   : > { %p2545_p2 = pneg %p2544_p1 }
  0x19   : > { %p2552_p8 = pnand %p2551_p7, %p2545_p2 }
  0x1b   : > { %2555 = shalt.err (!%p2552_p8)
}
  0x1c   : > { %s2624_s6 = smov [#allocation2]   ;;  %179 = sbr.rel (%p2703_p10) target bundleno = 681 (0x2a9), region = 36 }
  0x1d   : > { %2493 = dma.vmem_to_smem (!%p2491_p12), %s152_s30, 64, %s2624_s6, [#allocation4]  }
  0x23   : > { %2601 = dma.done.wait (%p2498_p9), [#allocation4], 64  }
  0x24   : > { %2603 = vsyncadd (%p2498_p9), [#allocation4], 4294967232 }
  0x25   : > { %185 = sfence }
  0x26   : > { %v619_v0 = vld [vmem:[%s3875_s1 + $0x20] sm:$0xff]  ;;  %v429_v1 = vld [vmem:[%s3875_s1 + $0x10] sm:$0xff]  ;;  %v3880_v2 = vmov 0   ;;  %v620_v3 = vld [vmem:[%s3875_s1 + $0x28] sm:$0xff]  ;;  %s2250_s28 = sshll.u32 %s2675_s19, 1  ;;  %s221_s30 = sld [smem:[#allocation2]]  ;;  %v3879_v40 = vlaneseq }
  0x27   : > { %2538 = vset.pattern.permute.xlu1 %v3880_v2  ;;  %2537 = vset.pattern.permute.xlu0 %v3880_v2  ;;  %v430_v4 = vld [vmem:[%s3875_s1 + $0x18] sm:$0xff]  ;;  %v241_v5 = vld [vmem:[%s3875_s1 + $0x8] sm:$0xff]  ;;  %v240_v6 = vld [vmem:[%s3875_s1] sm:$0xff]  ;;  %p207_p9 = scmp.lt.s32.totalorder %s2250_s28, 3  ;;  %s2254_s5 = sld [smem:[#allocation2 + $0x1]] }
  0x28   : > { %623 = vperm.xlu1 %2538, %v619_v0   ;;  %433 = vperm.xlu0 %2537, %v429_v1   ;;  %s2255_s6 = sld [smem:[#allocation2 + $0x2]]  ;;  %s2267_s10 = sld [smem:[#allocation2 + $0x100]]  ;;  %v2747_v43 = vshrl.u32 %v3879_v40, 7 }
  0x29   : > { %s3970_s28 = smov (!%p207_p9, %s2250_s28), 3  ;;  %s2268_s11 = sld [smem:[#allocation2 + $0x101]] }
  0x2a   : > { %s2251_s29 = sshll.u32 %s3970_s28, 2  ;;  %s2260_s12 = sld [smem:[#allocation2 + $0x80]]  ;;  %3913 = vst [vmem:[#allocation9_spill] sm:$0xff] %v2747_v43  ;;  %v2750_v46 = vsub.s32 0, %v2747_v43  ;;  %v2753_v47 = vsub.s32 1, %v2747_v43 }
  0x2b   : > { %s210_s9 = scalar_lea.vmem %s3877_s3, %s2251_s29  ;;  %s2261_s13 = sld [smem:[#allocation2 + $0x81]] }
  0x2c   : > { %628 = vperm.xlu1 %2538, %v620_v3   ;;  %438 = vperm.xlu0 %2537, %v430_v4   ;;  %v213_v7 = vld [vmem:[%s210_s9] ss:$4 sm:$0x3]  ;;  %v2252_v8 = vld [vmem:[%s210_s9 + $0x1] ss:$4 sm:$0x3]  ;;  %v222_v9 = vstv %s221_s30 }
  0x2d   : > { %v225_v10 = vstv %s2254_s5  ;;  %v223_v11 = vmul.f32 %v222_v9, %v213_v7  ;;  %v2253_v13 = vld [vmem:[%s210_s9 + $0x2] ss:$4 sm:$0x3]  ;;  %s2269_s14 = sld [smem:[#allocation2 + $0x102]]  ;;  %s2270_s22 = sld [smem:[#allocation2 + $0x103]]  ;;  %3914 = vst [vmem:[#allocation10_spill] sm:$0xff] %v2750_v46 }
  0x2e   : > { %v226_v12 = vmul.f32 %v2252_v8, %v225_v10  ;;  %v229_v14 = vstv %s2255_s6  ;;  %s2262_s20 = sld [smem:[#allocation2 + $0x82]]  ;;  %v601_v18 = vstv %s2267_s10  ;;  %s2263_s23 = sld [smem:[#allocation2 + $0x83]]  ;;  %3915 = vst [vmem:[#allocation11_spill] sm:$0xff] %v2753_v47 }
  0x2f   : > { %v230_v16 = vmul.f32 %v2253_v13, %v229_v14  ;;  %v604_v19 = vstv %s2268_s11  ;;  %v602_v22 = vmul.f32 %v601_v18, %v213_v7  ;;  %s2256_s29 = sld [smem:[#allocation2 + $0x3]]  ;;  %s203_s30 = sand.u32 1, %s2614_s16  }
  0x30   : > { %249 = vperm.xlu1 %2538, %v241_v5   ;;  %244 = vperm.xlu0 %2537, %v240_v6   ;;  %v227_v15 = vadd.f32 %v226_v12, %v223_v11  ;;  %v411_v20 = vstv %s2260_s12  ;;  %v605_v23 = vmul.f32 %v2252_v8, %v604_v19  ;;  %s2249_s5 = sshll.u32 %s203_s30, 1  ;;  %s2281_s6 = sshll.u32 %s2675_s19, 5 }
  0x31   : > { %v414_v21 = vstv %s2261_s13  ;;  %v412_v24 = vmul.f32 %v411_v20, %v213_v7  ;;  %s205_s7 = scalar_lea.vmem [#allocation5], %s2249_s5  ;;  %s3832_s11 = scalar_lea.hbm %s3878_s4, %s2281_s6 }
  0x32   : > { %v2744_v17 = vadd.f32 %v230_v16, %v227_v15  ;;  %v415_v25 = vmul.f32 %v2252_v8, %v414_v21  ;;  %v606_v28 = vadd.f32 %v605_v23, %v602_v22  ;;  %s2172_s8 = sshll.u32 %s205_s7, 4  ;;  %s2158_s19 = scalar_lea.sflag [#allocation3], %s203_s30  ;;  %s3834_s8 = int_to_ptr.vmem [resolvable:$true] %s2172_s8 }
  0x33   : > { %v608_v26 = vstv %s2269_s14  ;;  %v612_v34 = vstv %s2270_s22  ;;  %s2556_s12 = scalar_lea.vmem %s3834_s8, 32  ;;  %s2628_s13 = smov [#allocation5]  }
  0x34   : > { %3912 = vst [vmem:[#allocation8_spill] sm:$0xff] %v2744_v17  ;;  %v418_v27 = vstv %s2262_s20  ;;  %v609_v29 = vmul.f32 %v2253_v13, %v608_v26  ;;  %v416_v30 = vadd.f32 %v415_v25, %v412_v24  ;;  %v422_v35 = vstv %s2263_s23  ;;  %p2557_p10 = scmp.ne.s32.totalorder %s3834_s8, %s2556_s12  ;;  %s2560_s14 = sshll.u32 %s2628_s13, 4  ;;  %s2561_s14 = int_to_ptr.vmem [resolvable:$false] %s2560_s14 }
  0x35   : > { %v419_v31 = vmul.f32 %v2253_v13, %v418_v27  ;;  %s2562_s20 = scalar_lea.vmem %s2561_s14, 64  ;;  %p2563_p13 = scmp.lt.s32.totalorder %s3834_s8, %s2561_s14 }
  0x36   : > { %v610_v32 = vadd.f32 %v609_v29, %v606_v28  ;;  %p2558_p11 = pnand %p2557_p10, %p2692_p5  ;;  %p2564_p0 = scmp.lt.s32.totalorder %s2562_s20, %s2556_s12 }
  0x37   : > { %v420_v33 = vadd.f32 %v419_v31, %v416_v30 }
  0x38   : > { %v613_v36 = vadd.f32 %v612_v34, %v610_v32  ;;  %v2626_v32 = vmov 1966171168   ;;  %v2810_v34 = vadd.s32 8, %v2747_v43  ;;  %p2559_p12 = pneg %p2558_p11  ;;  %p2565_p1 = por %p2564_p0, %p2563_p13 }
  0x39   : > { %v423_v37 = vadd.f32 %v422_v35, %v420_v33  ;;  %v2807_v33 = vunpack.c.l.s4 %v2626_v32 }
  0x3a   : > { %v614_v38 = vmul.f32 1.25, %v613_v36  ;;  %3916 = vst [vmem:[#allocation12_spill] sm:$0xff] %v2810_v34  ;;  %p2566_p2 = pnand %p2565_p1, %p2559_p12 }
  0x3b   : > { %v424_v39 = vmul.f32 1.25, %v423_v37 }
  0x3c   : > { %v2271_v41 = vclamps-f32 %v614_v38, 1.0 }
  0x3d   : > { %v2264_v42 = vclamps-f32 %v424_v39, 1.0 }
  0x3e   : > { %v617_v44 = vadd.f32 1.0, %v2271_v41 }
  0x3f   : > { %v427_v45 = vadd.f32 1.0, %v2264_v42 }
  0x40   : > { %v2755_v48 = vmul.f32 0.5, %v617_v44 }
  0x41   : > { %v2757_v49 = vmul.f32 0.5, %v427_v45 }
  0x42   : > { %v2761_v50 = vrot.slane %v2755_v48, %v2750_v46  ;;  %v2765_v51 = vrot.slane %v2755_v48, %v2753_v47 }
  0x43   : > { %v2769_v52 = vrot.slane %v2757_v49, %v2750_v46  ;;  %v2773_v53 = vrot.slane %v2757_v49, %v2753_v47 }
  0xa7   : > { %v2775_v54 = vpop.permute.xlu1 %623  ;;  %v2777_v55 = vpop.permute.xlu0 %433 }
  0xa8   : > { %vm642_vm0 = vcmp.lt.f32.partialorder %v2775_v54, %v2761_v50  ;;  %vm643_vm1 = vcmp.lt.f32.partialorder %v2775_v54, %v2765_v51  ;;  %vm452_vm2 = vcmp.lt.f32.partialorder %v2777_v55, %v2769_v52  ;;  %vm453_vm3 = vcmp.lt.f32.partialorder %v2777_v55, %v2773_v53 }
  0xa9   : > { %v646_v56 = vsel %vm642_vm0, 1, %v3880_v2  ;;  %v647_v57 = vsel %vm643_vm1, 1, %v3880_v2  ;;  %v456_v58 = vsel %vm452_vm2, 1, %v3880_v2  ;;  %v457_v59 = vsel %vm453_vm3, 1, %v3880_v2 }
  0xab   : > { %v2791_v60 = vpop.permute.xlu1 %628  ;;  %v2793_v61 = vpop.permute.xlu0 %438 }
  0xac   : > { %vm644_vm4 = vcmp.lt.f32.partialorder %v2791_v60, %v2761_v50  ;;  %vm645_vm5 = vcmp.lt.f32.partialorder %v2791_v60, %v2765_v51  ;;  %vm454_vm6 = vcmp.lt.f32.partialorder %v2793_v61, %v2769_v52  ;;  %vm455_vm7 = vcmp.lt.f32.partialorder %v2793_v61, %v2773_v53 }
  0xad   : > { %v648_v62 = vsel %vm644_vm4, 1, %v3880_v2  ;;  %v649_v63 = vsel %vm645_vm5, 1, %v3880_v2  ;;  %v458_v0 = vsel %vm454_vm6, 1, %v3880_v2  ;;  %v459_v1 = vsel %vm455_vm7, 1, %v3880_v2 }
  0xae   : > { %v650_v3 = vadd.s32 %v648_v62, %v646_v56  ;;  %v657_v4 = vadd.s32 %v649_v63, %v647_v57  ;;  %v460_v5 = vadd.s32 %v458_v0, %v456_v58  ;;  %v467_v6 = vadd.s32 %v459_v1, %v457_v59 }
  0xb0   : > { %v651_v7 = vrot.slane %v650_v3, 4  ;;  %v658_v8 = vrot.slane %v657_v4, 4  ;;  %v461_v9 = vrot.slane %v460_v5, 4  ;;  %v468_v10 = vrot.slane %v467_v6, 4 }
  0xb2   : > { %v652_v11 = vadd.s32 %v651_v7, %v650_v3  ;;  %v659_v12 = vadd.s32 %v658_v8, %v657_v4  ;;  %v462_v13 = vadd.s32 %v461_v9, %v460_v5  ;;  %v469_v14 = vadd.s32 %v468_v10, %v467_v6 }
  0xb4   : > { %v653_v15 = vrot.slane %v652_v11, 2  ;;  %v660_v16 = vrot.slane %v659_v12, 2  ;;  %v463_v18 = vrot.slane %v462_v13, 2  ;;  %v470_v19 = vrot.slane %v469_v14, 2 }
  0xb6   : > { %v654_v20 = vadd.s32 %v653_v15, %v652_v11  ;;  %v661_v21 = vadd.s32 %v660_v16, %v659_v12  ;;  %v464_v22 = vadd.s32 %v463_v18, %v462_v13  ;;  %v471_v23 = vadd.s32 %v470_v19, %v469_v14 }
  0xb8   : > { %v655_v24 = vrot.slane %v654_v20, 1  ;;  %v662_v25 = vrot.slane %v661_v21, 1  ;;  %v465_v26 = vrot.slane %v464_v22, 1  ;;  %v472_v27 = vrot.slane %v471_v23, 1 }
  0xba   : > { %v656_v28 = vadd.s32 %v655_v24, %v654_v20  ;;  %v663_v29 = vadd.s32 %v662_v25, %v661_v21  ;;  %v466_v30 = vadd.s32 %v465_v26, %v464_v22  ;;  %v473_v31 = vadd.s32 %v472_v27, %v471_v23 }
  0xbc   : > { %vm664_vm8 = vcmp.ge.s32.totalorder %v656_v28, 12  ;;  %vm665_vm9 = vcmp.ge.s32.totalorder %v663_v29, 12  ;;  %vm474_vm10 = vcmp.ge.s32.totalorder %v466_v30, 10  ;;  %vm475_vm11 = vcmp.ge.s32.totalorder %v473_v31, 10 }
  0xbd   : > { %v2812_v35 = vsel %vm664_vm8, 11, %v656_v28  ;;  %v2814_v36 = vsel %vm665_vm9, 11, %v663_v29  ;;  %v2816_v37 = vsel %vm474_vm10, 9, %v466_v30  ;;  %v2818_v38 = vsel %vm475_vm11, 9, %v473_v31 }
  0xbe   : > { %v2272_v39 = vadd.s32 4294967295, %v2812_v35  ;;  %v2273_v41 = vadd.s32 4294967295, %v2814_v36  ;;  %vm700_vm12 = vcmp.eq.s32.totalorder %v2747_v43, %v2812_v35  ;;  %vm701_vm13 = vcmp.eq.s32.totalorder %v2747_v43, %v2814_v36 }
  0xbf   : > { %vm702_vm14 = vcmp.eq.s32.totalorder %v2810_v34, %v2812_v35  ;;  %vm703_vm15 = vcmp.eq.s32.totalorder %v2810_v34, %v2814_v36  ;;  %v704_v42 = vsel %vm700_vm12, %v2775_v54, 0.0  ;;  %v705_v44 = vsel %vm701_vm13, %v2775_v54, 0.0 }
  0xc0   : > { %vm670_vm0 = vcmp.gt.s32.totalorder %v2272_v39, 0  ;;  %vm672_vm1 = vcmp.gt.s32.totalorder %v2273_v41, 0  ;;  %v706_v45 = vsel %vm702_vm14, %v2791_v60, 0.0  ;;  %v707_v56 = vsel %vm703_vm15, %v2791_v60, 0.0 }
  0xc1   : > { %v671_v57 = vsel %vm670_vm0, %v2272_v39, 0  ;;  %v673_v58 = vsel %vm672_vm1, %v2273_v41, 0  ;;  %v708_v59 = vadd.f32 %v706_v45, %v704_v42  ;;  %v715_v62 = vadd.f32 %v707_v56, %v705_v44 }
  0xc2   : > { %vm674_vm2 = vcmp.lt.s32.totalorder %v671_v57, 11  ;;  %vm676_vm3 = vcmp.lt.s32.totalorder %v673_v58, 11  ;;  %v2265_v63 = vadd.s32 4294967295, %v2816_v37  ;;  %v2266_v0 = vadd.s32 4294967295, %v2818_v38 }
  0xc3   : > { %v2836_v1 = vsel %vm674_vm2, %v671_v57, 11  ;;  %v2838_v3 = vsel %vm676_vm3, %v673_v58, 11  ;;  %v709_v4 = vrot.slane %v708_v59, 4  ;;  %v716_v5 = vrot.slane %v715_v62, 4 }
  0xc4   : > { %vm678_vm4 = vcmp.eq.s32.totalorder %v2747_v43, %v2836_v1  ;;  %vm679_vm5 = vcmp.eq.s32.totalorder %v2747_v43, %v2838_v3  ;;  %vm680_vm6 = vcmp.eq.s32.totalorder %v2810_v34, %v2836_v1  ;;  %vm681_vm7 = vcmp.eq.s32.totalorder %v2810_v34, %v2838_v3 }
  0xc5   : > { %v682_v6 = vsel %vm678_vm4, %v2775_v54, 0.0  ;;  %v683_v7 = vsel %vm679_vm5, %v2775_v54, 0.0  ;;  %v684_v8 = vsel %vm680_vm6, %v2791_v60, 0.0  ;;  %v685_v9 = vsel %vm681_vm7, %v2791_v60, 0.0 }
  0xc6   : > { %v686_v10 = vadd.f32 %v684_v8, %v682_v6  ;;  %v693_v11 = vadd.f32 %v685_v9, %v683_v7  ;;  %v710_v12 = vadd.f32 %v709_v4, %v708_v59  ;;  %v717_v13 = vadd.f32 %v716_v5, %v715_v62 }
  0xc7   : > { %vm480_vm8 = vcmp.gt.s32.totalorder %v2265_v63, 0  ;;  %vm482_vm9 = vcmp.gt.s32.totalorder %v2266_v0, 0  ;;  %vm510_vm10 = vcmp.eq.s32.totalorder %v2747_v43, %v2816_v37  ;;  %vm511_vm11 = vcmp.eq.s32.totalorder %v2747_v43, %v2818_v38 }
  0xc8   : > { %v687_v14 = vrot.slane %v686_v10, 4  ;;  %v694_v15 = vrot.slane %v693_v11, 4  ;;  %v711_v16 = vrot.slane %v710_v12, 2  ;;  %v718_v54 = vrot.slane %v717_v13, 2 }
  0xc9   : > { %v481_v18 = vsel %vm480_vm8, %v2265_v63, 0  ;;  %v483_v19 = vsel %vm482_vm9, %v2266_v0, 0  ;;  %vm512_vm12 = vcmp.eq.s32.totalorder %v2810_v34, %v2816_v37  ;;  %vm513_vm13 = vcmp.eq.s32.totalorder %v2810_v34, %v2818_v38 }
  0xca   : > { %v688_v60 = vadd.f32 %v687_v14, %v686_v10  ;;  %v695_v20 = vadd.f32 %v694_v15, %v693_v11  ;;  %v712_v21 = vadd.f32 %v711_v16, %v710_v12  ;;  %v719_v22 = vadd.f32 %v718_v54, %v717_v13 }
  0xcb   : > { %vm484_vm14 = vcmp.lt.s32.totalorder %v481_v18, 9  ;;  %vm486_vm15 = vcmp.lt.s32.totalorder %v483_v19, 9  ;;  %v514_v23 = vsel %vm510_vm10, %v2777_v55, 0.0  ;;  %v515_v24 = vsel %vm511_vm11, %v2777_v55, 0.0 }
  0xcc   : > { %v689_v25 = vrot.slane %v688_v60, 2  ;;  %v696_v26 = vrot.slane %v695_v20, 2  ;;  %v713_v27 = vrot.slane %v712_v21, 1  ;;  %v720_v28 = vrot.slane %v719_v22, 1 }
  0xcd   : > { %v2868_v29 = vsel %vm484_vm14, %v481_v18, 9  ;;  %v2870_v30 = vsel %vm486_vm15, %v483_v19, 9  ;;  %v516_v31 = vsel %vm512_vm12, %v2793_v61, 0.0  ;;  %v517_v32 = vsel %vm513_vm13, %v2793_v61, 0.0 }
  0xce   : > { %v690_v39 = vadd.f32 %v689_v25, %v688_v60  ;;  %v697_v41 = vadd.f32 %v696_v26, %v695_v20  ;;  %v714_v42 = vadd.f32 %v713_v27, %v712_v21  ;;  %v721_v44 = vadd.f32 %v720_v28, %v719_v22 }
  0xcf   : > { %vm488_vm0 = vcmp.eq.s32.totalorder %v2747_v43, %v2868_v29  ;;  %vm489_vm1 = vcmp.eq.s32.totalorder %v2747_v43, %v2870_v30  ;;  %vm490_vm2 = vcmp.eq.s32.totalorder %v2810_v34, %v2868_v29  ;;  %vm491_vm3 = vcmp.eq.s32.totalorder %v2810_v34, %v2870_v30 }
  0xd0   : > { %v691_v45 = vrot.slane %v690_v39, 1  ;;  %v698_v56 = vrot.slane %v697_v41, 1  ;;  %v742_v57 = vsub.f32 %v714_v42, %v2761_v50  ;;  %v743_v58 = vsub.f32 %v721_v44, %v2765_v51 }
  0xd1   : > { %v492_v59 = vsel %vm488_vm0, %v2777_v55, 0.0  ;;  %v493_v62 = vsel %vm489_vm1, %v2777_v55, 0.0  ;;  %v494_v63 = vsel %vm490_vm2, %v2793_v61, 0.0  ;;  %v495_v0 = vsel %vm491_vm3, %v2793_v61, 0.0 }
  0xd2   : > { %v348_v4 = vunpack.c.0.s8 %v2807_v33  ;;  %v692_v5 = vadd.f32 %v691_v45, %v690_v39  ;;  %v699_v6 = vadd.f32 %v698_v56, %v697_v41  ;;  %v744_v7 = vmax.f32 %v742_v57, 0.0 }
  0xd3   : > { %v496_v8 = vadd.f32 %v494_v63, %v492_v59  ;;  %v503_v9 = vadd.f32 %v495_v0, %v493_v62  ;;  %v518_v10 = vadd.f32 %v516_v31, %v514_v23  ;;  %v525_v11 = vadd.f32 %v517_v32, %v515_v24 }
  0xd4   : > { %v724_v50 = vcombine.low %v692_v5, %v699_v6  ;;  %v745_v12 = vmax.f32 %v743_v58, 0.0  ;;  %v2896_v14 = vsub.s32 %v348_v4, %v2747_v43  ;;  %vm747_vm4 = vcmp.eq.f32.partialorder %v744_v7, 0.0 }
  0xd5   : > { %v497_v51 = vrot.slane %v496_v8, 4  ;;  %v504_v13 = vrot.slane %v503_v9, 4  ;;  %v519_v55 = vrot.slane %v518_v10, 4  ;;  %v526_v16 = vrot.slane %v525_v11, 4 }
  0xd6   : > { %3917 = vst [vmem:[#allocation13_spill] sm:$0xff] %v2896_v14  ;;  %v731_v33 = vrot.slane %v724_v50, %v2896_v14  ;;  %vm748_vm5 = vcmp.eq.f32.partialorder %v745_v12, 0.0  ;;  %v749_v20 = vsel %vm747_vm4, 1, %v3880_v2  ;;  %v771_v6 = vcombine.low %v744_v7, %v745_v12 }
  0xd7   : > { %v498_v15 = vadd.f32 %v497_v51, %v496_v8  ;;  %v505_v61 = vadd.f32 %v504_v13, %v503_v9  ;;  %v520_v54 = vadd.f32 %v519_v55, %v518_v10  ;;  %v527_v60 = vadd.f32 %v526_v16, %v525_v11 }
  0xd8   : > { %v750_v22 = vsel %vm748_vm5, 1, %v3880_v2  ;;  %v738_v26 = vrot.slane %v731_v33, %v2896_v14  ;;  %v2909_v11 = vadd.s32 16, %v2747_v43  ;;  %v778_v55 = vrot.slane %v771_v6, %v2896_v14 }
  0xd9   : > { %v499_v18 = vrot.slane %v498_v15, 2  ;;  %v506_v19 = vrot.slane %v505_v61, 2  ;;  %v521_v21 = vrot.slane %v520_v54, 2  ;;  %v528_v25 = vrot.slane %v527_v60, 2 }
  0xda   : > { %v751_v39 = vcombine.low %v749_v20, %v750_v22  ;;  %v740_v56 = vsub.f32 %v2755_v48, %v738_v26  ;;  %v2912_v48 = vadd.s32 24, %v2747_v43  ;;  %v2943_v20 = vadd.s32 64, %v2747_v43 }
  0xdb   : > { %v500_v23 = vadd.f32 %v499_v18, %v498_v15  ;;  %v507_v24 = vadd.f32 %v506_v19, %v505_v61  ;;  %v522_v27 = vadd.f32 %v521_v21, %v520_v54  ;;  %v529_v32 = vadd.f32 %v528_v25, %v527_v60 }
  0xdc   : > { %v758_v62 = vrot.slane %v751_v39, %v2896_v14  ;;  %v741_v5 = vmax.f32 %v740_v56, 0.0  ;;  %v805_v61 = vmul.u32 12, %v2870_v30  ;;  %v804_v54 = vmul.u32 12, %v2868_v29 }
  0xdd   : > { %v501_v28 = vrot.slane %v500_v23, 1  ;;  %v508_v31 = vrot.slane %v507_v24, 1  ;;  %v523_v41 = vrot.slane %v522_v27, 1  ;;  %v530_v45 = vrot.slane %v529_v32, 1 }
  0xde   : > { %v765_v50 = vrot.slane %v758_v62, %v2896_v14  ;;  %vm2923_vm8 = vcmp.eq.f32.partialorder %v741_v5, 0.0  ;;  %v995_v19 = vmul.u32 12, %v2818_v38  ;;  %v2940_v60 = vadd.s32 56, %v2747_v43 }
  0xdf   : > { %v502_v42 = vadd.f32 %v501_v28, %v500_v23  ;;  %v509_v44 = vadd.f32 %v508_v31, %v507_v24  ;;  %v524_v57 = vadd.f32 %v523_v41, %v522_v27  ;;  %v531_v58 = vadd.f32 %v530_v45, %v529_v32 }
  0xe0   : > { %vm2934_vm9 = vcmp.ne.s32.totalorder %v765_v50, 0  ;;  %v994_v21 = vmul.u32 12, %v2816_v37  ;;  %v2953_v22 = vadd.s32 72, %v2747_v43  ;;  %v785_v38 = vrot.slane %v778_v55, %v2896_v14 }
  0xe1   : > { %v534_v59 = vcombine.low %v502_v42, %v509_v44  ;;  %v552_v63 = vsub.f32 %v524_v57, %v2769_v52  ;;  %v553_v4 = vsub.f32 %v531_v58, %v2773_v53  ;;  %v2916_v52 = vadd.s32 32, %v2747_v43  ;;  %vm767_vm10 = vmand %vm2923_vm8, %vm2934_vm9 }
  0xe2   : > { %v2919_v53 = vadd.s32 40, %v2747_v43  ;;  %v2957_v23 = vadd.s32 %v805_v61, %v2838_v3  ;;  %v2960_v24 = vadd.s32 %v805_v61, %v2814_v36  ;;  %v2963_v25 = vadd.s32 80, %v2747_v43 }
  0xe3   : > { %v541_v0 = vrot.slane %v534_v59, %v2896_v14  ;;  %v554_v8 = vmax.f32 %v552_v63, 0.0  ;;  %v555_v10 = vmax.f32 %v553_v4, 0.0  ;;  %v2971_v27 = vadd.s32 %v804_v54, %v2836_v1 }
  0xe4   : > { %v2974_v28 = vadd.s32 %v995_v19, %v2838_v3  ;;  %v2976_v31 = vsel %vm767_vm10, 1.0, %v741_v5  ;;  %v2978_v32 = vsel %vm767_vm10, 1.0, %v785_v38  ;;  %v2981_v39 = vadd.s32 %v804_v54, %v2812_v35 }
  0xe5   : > { %v548_v9 = vrot.slane %v541_v0, %v2896_v14  ;;  %vm557_vm6 = vcmp.eq.f32.partialorder %v554_v8, 0.0  ;;  %vm558_vm7 = vcmp.eq.f32.partialorder %v555_v10, 0.0  ;;  %v581_v51 = vcombine.low %v554_v8, %v555_v10  ;;  %3924 = vst [vmem:[#allocation14_spill] sm:$0xff] %v2976_v31  ;;  %3925 = vst [vmem:[#allocation15_spill] sm:$0xff] %v2978_v32 }
  0xe6   : > { %v559_v12 = vsel %vm557_vm6, 1, %v3880_v2  ;;  %v560_v15 = vsel %vm558_vm7, 1, %v3880_v2  ;;  %v2984_v41 = vadd.s32 %v995_v19, %v2814_v36  ;;  %v2988_v44 = vadd.s32 %v994_v21, %v2836_v1 }
  0xe7   : > { %v550_v7 = vsub.f32 %v2757_v49, %v548_v9  ;;  %v561_v33 = vcombine.low %v559_v12, %v560_v15  ;;  %v2932_v49 = vadd.s32 48, %v2747_v43  ;;  %v588_v30 = vrot.slane %v581_v51, %v2896_v14 }
  0xe8   : > { %v2991_v45 = vadd.s32 %v994_v21, %v2812_v35  ;;  %vm810_vm14 = vcmp.eq.s32.totalorder %v2747_v43, %v2957_v23  ;;  %vm812_vm15 = vcmp.eq.s32.totalorder %v2810_v34, %v2957_v23  ;;  %vm888_vm0 = vcmp.eq.s32.totalorder %v2747_v43, %v2960_v24 }
  0xe9   : > { %v551_v16 = vmax.f32 %v550_v7, 0.0  ;;  %v568_v29 = vrot.slane %v561_v33, %v2896_v14  ;;  %v595_v42 = vrot.slane %v588_v30, %v2896_v14  ;;  %vm890_vm1 = vcmp.eq.s32.totalorder %v2810_v34, %v2960_v24 }
  0xea   : > { %vm1000_vm2 = vcmp.eq.s32.totalorder %v2747_v43, %v2974_v28  ;;  %vm1002_vm3 = vcmp.eq.s32.totalorder %v2810_v34, %v2974_v28  ;;  %vm1110_vm4 = vcmp.eq.s32.totalorder %v2747_v43, %v2984_v41  ;;  %vm1112_vm5 = vcmp.eq.s32.totalorder %v2810_v34, %v2984_v41 }
  0xeb   : > { %vm2965_vm11 = vcmp.eq.f32.partialorder %v551_v16, 0.0  ;;  %v575_v37 = vrot.slane %v568_v29, %v2896_v14  ;;  %vm809_vm6 = vcmp.eq.s32.totalorder %v2747_v43, %v2971_v27  ;;  %vm811_vm7 = vcmp.eq.s32.totalorder %v2810_v34, %v2971_v27 }
  0xec   : > { %vm887_vm8 = vcmp.eq.s32.totalorder %v2747_v43, %v2981_v39  ;;  %vm999_vm10 = vcmp.eq.s32.totalorder %v2747_v43, %v2988_v44  ;;  %vm814_vm9 = vcmp.eq.s32.totalorder %v2909_v11, %v2957_v23 }
  0xed   : > { %vm576_vm12 = vcmp.ne.s32.totalorder %v575_v37, 0 }
  0xee   : > { %vm577_vm13 = vmand %vm2965_vm11, %vm576_vm12  ;;  %vm1001_vm11 = vcmp.eq.s32.totalorder %v2810_v34, %v2988_v44  ;;  %vm816_vm12 = vcmp.eq.s32.totalorder %v2912_v48, %v2957_v23 }
  0xef   : > { %v3003_v36 = vsel %vm577_vm13, 1.0, %v551_v16  ;;  %v3005_v1 = vsel %vm577_vm13, 1.0, %v595_v42  ;;  %vm892_vm13 = vcmp.eq.s32.totalorder %v2909_v11, %v2960_v24 }
  0xf0   : > { %3926 = vst [vmem:[#allocation16_spill] sm:$0xff] %v3003_v36  ;;  %3927 = vst [vmem:[#allocation17_spill] sm:$0xff] %v3005_v1  ;;  %v808_v35 = vmul.f32 %v2978_v32, %v3005_v1  ;;  %v886_v3 = vmul.f32 %v2976_v31, %v3005_v1  ;;  %v998_v56 = vmul.f32 %v2978_v32, %v3003_v36 }
  0xf1   : > { %v1108_v57 = vmul.f32 %v2976_v31, %v3003_v36 }
  0xf2   : > { %v3032_v58 = vrot.slane %v808_v35, %v2753_v47  ;;  %v3035_v59 = vrot.slane %v886_v3, %v2753_v47  ;;  %v3042_v62 = vrot.slane %v998_v56, %v2753_v47  ;;  %v3051_v63 = vrot.slane %v808_v35, %v2750_v46 }
  0xf3   : > { %v3066_v5 = vrot.slane %v886_v3, %v2750_v46  ;;  %v3069_v6 = vrot.slane %v1108_v57, %v2753_v47  ;;  %v3080_v10 = vrot.slane %v998_v56, %v2750_v46  ;;  %v3085_v12 = vrot.slane %v1108_v57, %v2750_v46 }
  0xf4   : > { %v853_v0 = vsel %vm810_vm14, %v3032_v58, 0.0  ;;  %v855_v4 = vsel %vm812_vm15, %v3032_v58, 0.0  ;;  %v931_v8 = vsel %vm888_vm0, %v3035_v59, 0.0  ;;  %v933_v9 = vsel %vm890_vm1, %v3035_v59, 0.0 }
  0xf5   : > { %v963_v50 = vadd.f32 %v931_v8, %v853_v0  ;;  %v965_v7 = vadd.f32 %v933_v9, %v855_v4  ;;  %vm894_vm14 = vcmp.eq.s32.totalorder %v2912_v48, %v2960_v24  ;;  %v1043_v51 = vsel %vm1000_vm2, %v3042_v62, 0.0 }
  0xf6   : > { %v1045_v13 = vsel %vm1002_vm3, %v3042_v62, 0.0  ;;  %vm1004_vm15 = vcmp.eq.s32.totalorder %v2909_v11, %v2974_v28  ;;  %v852_v61 = vsel %vm809_vm6, %v3051_v63, 0.0  ;;  %v854_v16 = vsel %vm811_vm7, %v3051_v63, 0.0 }
  0xf7   : > { %v1075_v55 = vadd.f32 %v1043_v51, %v963_v50  ;;  %v1077_v15 = vadd.f32 %v1045_v13, %v965_v7  ;;  %v1153_v33 = vsel %vm1110_vm4, %v3069_v6, 0.0  ;;  %v1155_v54 = vsel %vm1112_vm5, %v3069_v6, 0.0 }
  0xf8   : > { %v930_v18 = vsel %vm887_vm8, %v3066_v5, 0.0  ;;  %vm3928_vm0 = vcmp.eq.s32.totalorder %v2810_v34, %v2981_v39  ;;  %v1042_v21 = vsel %vm999_vm10, %v3080_v10, 0.0  ;;  %vm1006_vm1 = vcmp.eq.s32.totalorder %v2912_v48, %v2974_v28 }
  0xf9   : > { %v932_v19 = vsel %vm3928_vm0, %v3066_v5, 0.0  ;;  %v1185_v29 = vadd.f32 %v1153_v33, %v1075_v55  ;;  %v1187_v30 = vadd.f32 %v1155_v54, %v1077_v15  ;;  %v962_v38 = vadd.f32 %v930_v18, %v852_v61 }
  0xfa   : > { %v964_v26 = vadd.f32 %v932_v19, %v854_v16  ;;  %v1044_v37 = vsel %vm1001_vm11, %v3080_v10, 0.0  ;;  %vm3929_vm2 = vcmp.eq.s32.totalorder %v2747_v43, %v2991_v45  ;;  %vm3930_vm3 = vcmp.eq.s32.totalorder %v2810_v34, %v2991_v45 }
  0xfb   : > { %v1152_v42 = vsel %vm3929_vm2, %v3085_v12, 0.0  ;;  %v1217_v35 = vand.u32 4294901760, %v1185_v29  ;;  %v1221_v3 = vand.u32 4294901760, %v1187_v30  ;;  %v1154_v56 = vsel %vm3930_vm3, %v3085_v12, 0.0 }
  0xfc   : > { %v857_v57 = vsel %vm814_vm9, %v3032_v58, 0.0  ;;  %v1074_v0 = vadd.f32 %v1042_v21, %v962_v38  ;;  %v1076_v4 = vadd.f32 %v1044_v37, %v964_v26  ;;  %v859_v8 = vsel %vm816_vm12, %v3032_v58, 0.0 }
  0xfd   : > { %v935_v9 = vsel %vm892_vm13, %v3035_v59, 0.0  ;;  %v3151_v50 = vpack.c.bf16 %v1221_v3, %v1217_v35  ;;  %v3153_v7 = vsub.f32 %v1185_v29, %v1217_v35  ;;  %v3155_v51 = vsub.f32 %v1187_v30, %v1221_v3 }
  0xfe   : > { %v937_v13 = vsel %vm894_vm14, %v3035_v59, 0.0  ;;  %v1184_v55 = vadd.f32 %v1152_v42, %v1074_v0  ;;  %v1186_v15 = vadd.f32 %v1154_v56, %v1076_v4  ;;  %v967_v61 = vadd.f32 %v935_v9, %v857_v57 }
  0xff   : > { %v969_v16 = vadd.f32 %v937_v13, %v859_v8  ;;  %2283 = vmatprep.subr.bf16.mxu1 %v3151_v50  ;;  %2379 = vmatprep.subr.bf16.mxu0 %v3151_v50  ;;  %v1047_v33 = vsel %vm1004_vm15, %v3042_v62, 0.0  ;;  %v1049_v54 = vsel %vm1006_vm1, %v3042_v62, 0.0  ;;  %vm1114_vm4 = vcmp.eq.s32.totalorder %v2909_v11, %v2984_v41 }
 0x100   : > { %vm1116_vm5 = vcmp.eq.s32.totalorder %v2912_v48, %v2984_v41  ;;  %v1219_v18 = vand.u32 4294901760, %v1184_v55  ;;  %v1223_v19 = vand.u32 4294901760, %v1186_v15  ;;  %v1079_v29 = vadd.f32 %v1047_v33, %v967_v61 }
 0x101   : > { %v1081_v30 = vadd.f32 %v1049_v54, %v969_v16  ;;  %v1157_v21 = vsel %vm1114_vm4, %v3069_v6, 0.0  ;;  %v1159_v38 = vsel %vm1116_vm5, %v3069_v6, 0.0  ;;  %vm813_vm6 = vcmp.eq.s32.totalorder %v2909_v11, %v2971_v27 }
 0x102   : > { %vm815_vm7 = vcmp.eq.s32.totalorder %v2912_v48, %v2971_v27  ;;  %v3181_v26 = vpack.c.bf16 %v1223_v19, %v1219_v18  ;;  %v3183_v37 = vsub.f32 %v1184_v55, %v1219_v18  ;;  %v3185_v42 = vsub.f32 %v1186_v15, %v1223_v19 }
 0x103   : > { %v1189_v35 = vadd.f32 %v1157_v21, %v1079_v29  ;;  %v1191_v3 = vadd.f32 %v1159_v38, %v1081_v30  ;;  %v856_v56 = vsel %vm813_vm6, %v3051_v63, 0.0  ;;  %v858_v57 = vsel %vm815_vm7, %v3051_v63, 0.0 }
 0x104   : > { %vm891_vm8 = vcmp.eq.s32.totalorder %v2909_v11, %v2981_v39  ;;  %2285 = vmatpush1.bf16.msra.mxu1 %v3181_v26  ;;  %2381 = vmatpush1.bf16.msra.mxu0 %v3181_v26  ;;  %vm893_vm9 = vcmp.eq.s32.totalorder %v2912_v48, %v2981_v39  ;;  %vm1003_vm10 = vcmp.eq.s32.totalorder %v2909_v11, %v2988_v44 }
 0x105   : > { %v1225_v0 = vand.u32 4294901760, %v1189_v35  ;;  %v934_v4 = vsel %vm891_vm8, %v3066_v5, 0.0  ;;  %v1229_v8 = vand.u32 4294901760, %v1191_v3  ;;  %v936_v9 = vsel %vm893_vm9, %v3066_v5, 0.0 }
 0x106   : > { %v966_v13 = vadd.f32 %v934_v4, %v856_v56  ;;  %vm1005_vm11 = vcmp.eq.s32.totalorder %v2912_v48, %v2988_v44  ;;  %v968_v15 = vadd.f32 %v936_v9, %v858_v57  ;;  %v1046_v61 = vsel %vm1003_vm10, %v3080_v10, 0.0 }
 0x107   : > { %v3201_v55 = vsub.f32 %v1189_v35, %v1225_v0  ;;  %v1048_v16 = vsel %vm1005_vm11, %v3080_v10, 0.0  ;;  %v3205_v33 = vpack.c.bf16 %v1229_v8, %v1225_v0  ;;  %v3207_v54 = vsub.f32 %v1191_v3, %v1229_v8 }
 0x108   : > { %v1078_v18 = vadd.f32 %v1046_v61, %v966_v13  ;;  %vm1113_vm12 = vcmp.eq.s32.totalorder %v2909_v11, %v2991_v45  ;;  %v1080_v19 = vadd.f32 %v1048_v16, %v968_v15  ;;  %vm1115_vm13 = vcmp.eq.s32.totalorder %v2912_v48, %v2991_v45 }
 0x109   : > { %v1156_v29 = vsel %vm1113_vm12, %v3085_v12, 0.0  ;;  %vm818_vm14 = vcmp.eq.s32.totalorder %v2916_v52, %v2957_v23  ;;  %2287 = vmatprep.subr.bf16.mxu1 %v3205_v33  ;;  %2383 = vmatprep.subr.bf16.mxu0 %v3205_v33  ;;  %v1158_v30 = vsel %vm1115_vm13, %v3085_v12, 0.0  ;;  %vm820_vm15 = vcmp.eq.s32.totalorder %v2919_v53, %v2957_v23 }
 0x10a   : > { %v1188_v21 = vadd.f32 %v1156_v29, %v1078_v18  ;;  %v861_v11 = vsel %vm818_vm14, %v3032_v58, 0.0  ;;  %v1190_v38 = vadd.f32 %v1158_v30, %v1080_v19  ;;  %v863_v48 = vsel %vm820_vm15, %v3032_v58, 0.0 }
 0x10b   : > { %vm896_vm0 = vcmp.eq.s32.totalorder %v2916_v52, %v2960_v24  ;;  %vm898_vm1 = vcmp.eq.s32.totalorder %v2919_v53, %v2960_v24  ;;  %vm1008_vm2 = vcmp.eq.s32.totalorder %v2916_v52, %v2974_v28  ;;  %vm1010_vm3 = vcmp.eq.s32.totalorder %v2919_v53, %v2974_v28 }
 0x10c   : > { %v1227_v35 = vand.u32 4294901760, %v1188_v21  ;;  %v939_v3 = vsel %vm896_vm0, %v3035_v59, 0.0  ;;  %v941_v56 = vsel %vm898_vm1, %v3035_v59, 0.0  ;;  %v1231_v57 = vand.u32 4294901760, %v1190_v38 }
 0x10d   : > { %v971_v0 = vadd.f32 %v939_v3, %v861_v11  ;;  %v973_v4 = vadd.f32 %v941_v56, %v863_v48  ;;  %v1051_v9 = vsel %vm1008_vm2, %v3042_v62, 0.0  ;;  %v1053_v13 = vsel %vm1010_vm3, %v3042_v62, 0.0 }
 0x10e   : > { %v3233_v8 = vsub.f32 %v1188_v21, %v1227_v35  ;;  %vm1118_vm4 = vcmp.eq.s32.totalorder %v2916_v52, %v2984_v41  ;;  %v3239_v15 = vpack.c.bf16 %v1231_v57, %v1227_v35  ;;  %v3241_v61 = vsub.f32 %v1190_v38, %v1231_v57 }
 0x10f   : > { %v1083_v16 = vadd.f32 %v1051_v9, %v971_v0  ;;  %v1085_v18 = vadd.f32 %v1053_v13, %v973_v4  ;;  %vm1120_vm5 = vcmp.eq.s32.totalorder %v2919_v53, %v2984_v41  ;;  %v1161_v19 = vsel %vm1118_vm4, %v3069_v6, 0.0 }
 0x110   : > { %3931 = vst [vmem:[#allocation18_spill] sm:$0xff] %v3239_v15  ;;  %vm817_vm6 = vcmp.eq.s32.totalorder %v2916_v52, %v2971_v27  ;;  %vm819_vm7 = vcmp.eq.s32.totalorder %v2919_v53, %v2971_v27  ;;  %2289 = vmatpush1.bf16.msra.mxu1 %v3239_v15  ;;  %2385 = vmatpush1.bf16.msra.mxu0 %v3239_v15  ;;  %v1163_v29 = vsel %vm1120_vm5, %v3069_v6, 0.0 }
 0x111   : > { %v1193_v30 = vadd.f32 %v1161_v19, %v1083_v16  ;;  %v860_v21 = vsel %vm817_vm6, %v3051_v63, 0.0  ;;  %v862_v11 = vsel %vm819_vm7, %v3051_v63, 0.0  ;;  %v1195_v38 = vadd.f32 %v1163_v29, %v1085_v18 }
 0x112   : > { %vm895_vm8 = vcmp.eq.s32.totalorder %v2916_v52, %v2981_v39  ;;  %vm897_vm9 = vcmp.eq.s32.totalorder %v2919_v53, %v2981_v39  ;;  %vm1007_vm10 = vcmp.eq.s32.totalorder %v2916_v52, %v2988_v44  ;;  %vm1009_vm11 = vcmp.eq.s32.totalorder %v2919_v53, %v2988_v44 }
 0x113   : > { %v1233_v48 = vand.u32 4294901760, %v1193_v30  ;;  %v938_v35 = vsel %vm895_vm8, %v3066_v5, 0.0  ;;  %v940_v3 = vsel %vm897_vm9, %v3066_v5, 0.0  ;;  %v1237_v56 = vand.u32 4294901760, %v1195_v38 }
 0x114   : > { %v970_v57 = vadd.f32 %v938_v35, %v860_v21  ;;  %v972_v0 = vadd.f32 %v940_v3, %v862_v11  ;;  %v1050_v4 = vsel %vm1007_vm10, %v3080_v10, 0.0  ;;  %v1052_v13 = vsel %vm1009_vm11, %v3080_v10, 0.0 }
 0x115   : > { %v3266_v9 = vsub.f32 %v1193_v30, %v1233_v48  ;;  %vm1117_vm12 = vcmp.eq.s32.totalorder %v2916_v52, %v2991_v45  ;;  %vm1119_vm13 = vcmp.eq.s32.totalorder %v2919_v53, %v2991_v45  ;;  %v3273_v16 = vpack.c.bf16 %v1237_v56, %v1233_v48 }
 0x116   : > { %v3275_v18 = vsub.f32 %v1195_v38, %v1237_v56  ;;  %v1082_v19 = vadd.f32 %v1050_v4, %v970_v57  ;;  %v1084_v29 = vadd.f32 %v1052_v13, %v972_v0  ;;  %v1160_v21 = vsel %vm1117_vm12, %v3085_v12, 0.0 }
 0x117   : > { %3932 = vst [vmem:[#allocation19_spill] sm:$0xff] %v3273_v16  ;;  %v1162_v11 = vsel %vm1119_vm13, %v3085_v12, 0.0  ;;  %vm822_vm14 = vcmp.eq.s32.totalorder %v2932_v49, %v2957_v23  ;;  %vm824_vm15 = vcmp.eq.s32.totalorder %v2940_v60, %v2957_v23  ;;  %2291 = vmatprep.subr.bf16.mxu1 %v3273_v16  ;;  %2387 = vmatprep.subr.bf16.mxu0 %v3273_v16 }
 0x118   : > { %v1192_v52 = vadd.f32 %v1160_v21, %v1082_v19  ;;  %v1194_v53 = vadd.f32 %v1162_v11, %v1084_v29  ;;  %v865_v30 = vsel %vm822_vm14, %v3032_v58, 0.0  ;;  %v867_v38 = vsel %vm824_vm15, %v3032_v58, 0.0 }
 0x119   : > { %vm900_vm0 = vcmp.eq.s32.totalorder %v2932_v49, %v2960_v24  ;;  %vm902_vm1 = vcmp.eq.s32.totalorder %v2940_v60, %v2960_v24  ;;  %vm1012_vm2 = vcmp.eq.s32.totalorder %v2932_v49, %v2974_v28  ;;  %vm1014_vm3 = vcmp.eq.s32.totalorder %v2940_v60, %v2974_v28 }
 0x11a   : > { %v1235_v48 = vand.u32 4294901760, %v1192_v52  ;;  %v1239_v35 = vand.u32 4294901760, %v1194_v53  ;;  %v943_v3 = vsel %vm900_vm0, %v3035_v59, 0.0  ;;  %v945_v56 = vsel %vm902_vm1, %v3035_v59, 0.0 }
 0x11b   : > { %v975_v57 = vadd.f32 %v943_v3, %v865_v30  ;;  %v977_v0 = vadd.f32 %v945_v56, %v867_v38  ;;  %v1055_v4 = vsel %vm1012_vm2, %v3042_v62, 0.0  ;;  %v1057_v13 = vsel %vm1014_vm3, %v3042_v62, 0.0 }
 0x11c   : > { %v3299_v19 = vpack.c.bf16 %v1239_v35, %v1235_v48  ;;  %v3301_v29 = vsub.f32 %v1192_v52, %v1235_v48  ;;  %v3303_v21 = vsub.f32 %v1194_v53, %v1239_v35  ;;  %vm1122_vm4 = vcmp.eq.s32.totalorder %v2932_v49, %v2984_v41 }
 0x11d   : > { %v1087_v11 = vadd.f32 %v1055_v4, %v975_v57  ;;  %v1089_v40 = vadd.f32 %v1057_v13, %v977_v0  ;;  %vm1124_vm5 = vcmp.eq.s32.totalorder %v2940_v60, %v2984_v41  ;;  %v1165_v30 = vsel %vm1122_vm4, %v3069_v6, 0.0 }
 0x11e   : > { %3933 = vst [vmem:[#allocation20_spill] sm:$0xff] %v3299_v19  ;;  %2293 = vmatpush1.bf16.msra.mxu1 %v3299_v19  ;;  %2389 = vmatpush1.bf16.msra.mxu0 %v3299_v19  ;;  %v1167_v38 = vsel %vm1124_vm5, %v3069_v6, 0.0  ;;  %vm821_vm6 = vcmp.eq.s32.totalorder %v2932_v49, %v2971_v27  ;;  %vm823_vm7 = vcmp.eq.s32.totalorder %v2940_v60, %v2971_v27 }
 0x11f   : > { %vm899_vm8 = vcmp.eq.s32.totalorder %v2932_v49, %v2981_v39  ;;  %v1197_v52 = vadd.f32 %v1165_v30, %v1087_v11  ;;  %v1199_v53 = vadd.f32 %v1167_v38, %v1089_v40  ;;  %v864_v48 = vsel %vm821_vm6, %v3051_v63, 0.0 }
 0x120   : > { %v866_v35 = vsel %vm823_vm7, %v3051_v63, 0.0  ;;  %vm901_vm9 = vcmp.eq.s32.totalorder %v2940_v60, %v2981_v39  ;;  %v942_v3 = vsel %vm899_vm8, %v3066_v5, 0.0  ;;  %vm1011_vm10 = vcmp.eq.s32.totalorder %v2932_v49, %v2988_v44 }
 0x121   : > { %vm1013_vm11 = vcmp.eq.s32.totalorder %v2940_v60, %v2988_v44  ;;  %v1241_v56 = vand.u32 4294901760, %v1197_v52  ;;  %v1245_v57 = vand.u32 4294901760, %v1199_v53  ;;  %v944_v0 = vsel %vm901_vm9, %v3066_v5, 0.0 }
 0x122   : > { %v974_v40 = vadd.f32 %v942_v3, %v864_v48  ;;  %v976_v4 = vadd.f32 %v944_v0, %v866_v35  ;;  %v1054_v13 = vsel %vm1011_vm10, %v3080_v10, 0.0  ;;  %v1056_v11 = vsel %vm1013_vm11, %v3080_v10, 0.0 }
 0x123   : > { %vm1121_vm12 = vcmp.eq.s32.totalorder %v2932_v49, %v2991_v45  ;;  %v3333_v30 = vpack.c.bf16 %v1245_v57, %v1241_v56  ;;  %v3335_v38 = vsub.f32 %v1197_v52, %v1241_v56  ;;  %v3337_v2 = vsub.f32 %v1199_v53, %v1245_v57 }
 0x124   : > { %v1086_v32 = vadd.f32 %v1054_v13, %v974_v40  ;;  %v1088_v31 = vadd.f32 %v1056_v11, %v976_v4  ;;  %vm1123_vm13 = vcmp.eq.s32.totalorder %v2940_v60, %v2991_v45  ;;  %v1164_v48 = vsel %vm1121_vm12, %v3085_v12, 0.0 }
 0x125   : > { %3934 = vst [vmem:[#allocation21_spill] sm:$0xff] %v3333_v30  ;;  %vm826_vm14 = vcmp.eq.s32.totalorder %v2943_v20, %v2957_v23  ;;  %2295 = vmatprep.subr.bf16.mxu1 %v3333_v30  ;;  %2391 = vmatprep.subr.bf16.mxu0 %v3333_v30  ;;  %v1166_v49 = vsel %vm1123_vm13, %v3085_v12, 0.0  ;;  %vm828_vm15 = vcmp.eq.s32.totalorder %v2953_v22, %v2957_v23 }
 0x126   : > { %v1196_v52 = vadd.f32 %v1164_v48, %v1086_v32  ;;  %v869_v53 = vsel %vm826_vm14, %v3032_v58, 0.0  ;;  %v1198_v35 = vadd.f32 %v1166_v49, %v1088_v31  ;;  %v871_v60 = vsel %vm828_vm15, %v3032_v58, 0.0 }
 0x127   : > { %vm904_vm0 = vcmp.eq.s32.totalorder %v2943_v20, %v2960_v24  ;;  %vm906_vm1 = vcmp.eq.s32.totalorder %v2953_v22, %v2960_v24  ;;  %vm1016_vm2 = vcmp.eq.s32.totalorder %v2943_v20, %v2974_v28  ;;  %vm1018_vm3 = vcmp.eq.s32.totalorder %v2953_v22, %v2974_v28 }
 0x128   : > { %v1243_v3 = vand.u32 4294901760, %v1196_v52  ;;  %v947_v56 = vsel %vm904_vm0, %v3035_v59, 0.0  ;;  %v949_v57 = vsel %vm906_vm1, %v3035_v59, 0.0  ;;  %v1247_v32 = vand.u32 4294901760, %v1198_v35 }
 0x129   : > { %v979_v0 = vadd.f32 %v947_v56, %v869_v53  ;;  %v981_v40 = vadd.f32 %v949_v57, %v871_v60  ;;  %v1059_v4 = vsel %vm1016_vm2, %v3042_v62, 0.0  ;;  %v1061_v13 = vsel %vm1018_vm3, %v3042_v62, 0.0 }
 0x12a   : > { %v3361_v31 = vsub.f32 %v1196_v52, %v1243_v3  ;;  %vm1126_vm4 = vcmp.eq.s32.totalorder %v2943_v20, %v2984_v41  ;;  %v3367_v11 = vpack.c.bf16 %v1247_v32, %v1243_v3  ;;  %v3369_v48 = vsub.f32 %v1198_v35, %v1247_v32 }
 0x12b   : > { %v1091_v49 = vadd.f32 %v1059_v4, %v979_v0  ;;  %v1093_v1 = vadd.f32 %v1061_v13, %v981_v40  ;;  %vm1128_vm5 = vcmp.eq.s32.totalorder %v2953_v22, %v2984_v41  ;;  %v1169_v53 = vsel %vm1126_vm4, %v3069_v6, 0.0 }
 0x12c   : > { %3935 = vst [vmem:[#allocation22_spill] sm:$0xff] %v3367_v11  ;;  %vm825_vm6 = vcmp.eq.s32.totalorder %v2943_v20, %v2971_v27  ;;  %vm827_vm7 = vcmp.eq.s32.totalorder %v2953_v22, %v2971_v27  ;;  %2297 = vmatpush1.bf16.msra.mxu1 %v3367_v11  ;;  %2393 = vmatpush1.bf16.msra.mxu0 %v3367_v11  ;;  %v1171_v52 = vsel %vm1128_vm5, %v3069_v6, 0.0  ;;  %v3388_v57 = vadd.s32 88, %v2747_v43 }
 0x12d   : > { %v1201_v35 = vadd.f32 %v1169_v53, %v1091_v49  ;;  %v868_v60 = vsel %vm825_vm6, %v3051_v63, 0.0  ;;  %v870_v3 = vsel %vm827_vm7, %v3051_v63, 0.0  ;;  %v1203_v56 = vadd.f32 %v1171_v52, %v1093_v1 }
 0x12e   : > { %vm903_vm8 = vcmp.eq.s32.totalorder %v2943_v20, %v2981_v39  ;;  %vm905_vm9 = vcmp.eq.s32.totalorder %v2953_v22, %v2981_v39  ;;  %vm1015_vm10 = vcmp.eq.s32.totalorder %v2943_v20, %v2988_v44  ;;  %vm1017_vm11 = vcmp.eq.s32.totalorder %v2953_v22, %v2988_v44 }
 0x12f   : > { %v1249_v32 = vand.u32 4294901760, %v1201_v35  ;;  %v946_v0 = vsel %vm903_vm8, %v3066_v5, 0.0  ;;  %v948_v40 = vsel %vm905_vm9, %v3066_v5, 0.0  ;;  %v1253_v4 = vand.u32 4294901760, %v1203_v56 }
 0x130   : > { %v978_v13 = vadd.f32 %v946_v0, %v868_v60  ;;  %v980_v1 = vadd.f32 %v948_v40, %v870_v3  ;;  %v1058_v53 = vsel %vm1015_vm10, %v3080_v10, 0.0  ;;  %v1060_v52 = vsel %vm1017_vm11, %v3080_v10, 0.0 }
 0x131   : > { %v3396_v49 = vsub.f32 %v1201_v35, %v1249_v32  ;;  %vm1125_vm12 = vcmp.eq.s32.totalorder %v2943_v20, %v2991_v45  ;;  %v3402_v36 = vpack.c.bf16 %v1253_v4, %v1249_v32  ;;  %vm1127_vm13 = vcmp.eq.s32.totalorder %v2953_v22, %v2991_v45 }
 0x132   : > { %v1090_v14 = vadd.f32 %v1058_v53, %v978_v13  ;;  %v1092_v34 = vadd.f32 %v1060_v52, %v980_v1  ;;  %v1168_v60 = vsel %vm1125_vm12, %v3085_v12, 0.0  ;;  %v1170_v3 = vsel %vm1127_vm13, %v3085_v12, 0.0 }
 0x133   : > { %3936 = vst [vmem:[#allocation23_spill] sm:$0xff] %v3402_v36  ;;  %vm830_vm14 = vcmp.eq.s32.totalorder %v2963_v25, %v2957_v23  ;;  %vm832_vm15 = vcmp.eq.s32.totalorder %v3388_v57, %v2957_v23  ;;  %2299 = vmatprep.subr.bf16.mxu1 %v3402_v36  ;;  %2395 = vmatprep.subr.bf16.mxu0 %v3402_v36 }
 0x134   : > { %v1200_v20 = vadd.f32 %v1168_v60, %v1090_v14  ;;  %v1202_v35 = vadd.f32 %v1170_v3, %v1092_v34  ;;  %v873_v32 = vsel %vm830_vm14, %v3032_v58, 0.0  ;;  %v875_v22 = vsel %vm832_vm15, %v3032_v58, 0.0 }
 0x135   : > { %v3416_v0 = vsub.f32 %v1203_v56, %v1253_v4  ;;  %vm908_vm0 = vcmp.eq.s32.totalorder %v2963_v25, %v2960_v24  ;;  %vm910_vm1 = vcmp.eq.s32.totalorder %v3388_v57, %v2960_v24  ;;  %vm1020_vm2 = vcmp.eq.s32.totalorder %v2963_v25, %v2974_v28 }
 0x136   : > { %v1251_v40 = vand.u32 4294901760, %v1200_v20  ;;  %v1255_v13 = vand.u32 4294901760, %v1202_v35  ;;  %v951_v14 = vsel %vm908_vm0, %v3035_v59, 0.0  ;;  %v953_v34 = vsel %vm910_vm1, %v3035_v59, 0.0 }
 0x137   : > { %v983_v1 = vadd.f32 %v951_v14, %v873_v32  ;;  %v985_v53 = vadd.f32 %v953_v34, %v875_v22  ;;  %vm1022_vm3 = vcmp.eq.s32.totalorder %v3388_v57, %v2974_v28  ;;  %v1063_v56 = vsel %vm1020_vm2, %v3042_v62, 0.0 }
 0x138   : > { %v3429_v4 = vpack.c.bf16 %v1255_v13, %v1251_v40  ;;  %v3431_v52 = vsub.f32 %v1200_v20, %v1251_v40  ;;  %v1065_v60 = vsel %vm1022_vm3, %v3042_v62, 0.0  ;;  %vm1130_vm4 = vcmp.eq.s32.totalorder %v2963_v25, %v2984_v41 }
 0x139   : > { %v1095_v3 = vadd.f32 %v1063_v56, %v983_v1  ;;  %v1097_v47 = vadd.f32 %v1065_v60, %v985_v53  ;;  %vm1132_vm5 = vcmp.eq.s32.totalorder %v3388_v57, %v2984_v41  ;;  %v1173_v32 = vsel %vm1130_vm4, %v3069_v6, 0.0 }
 0x13a   : > { %3937 = vst [vmem:[#allocation24_spill] sm:$0xff] %v3429_v4  ;;  %2301 = vmatpush1.bf16.msra.mxu1 %v3429_v4  ;;  %2397 = vmatpush1.bf16.msra.mxu0 %v3429_v4  ;;  %v1175_v22 = vsel %vm1132_vm5, %v3069_v6, 0.0  ;;  %vm829_vm6 = vcmp.eq.s32.totalorder %v2963_v25, %v2971_v27  ;;  %vm831_vm7 = vcmp.eq.s32.totalorder %v3388_v57, %v2971_v27 }
 0x13b   : > { %vm907_vm8 = vcmp.eq.s32.totalorder %v2963_v25, %v2981_v39  ;;  %v1205_v20 = vadd.f32 %v1173_v32, %v1095_v3  ;;  %v1207_v40 = vadd.f32 %v1175_v22, %v1097_v47  ;;  %v872_v14 = vsel %vm829_vm6, %v3051_v63, 0.0 }
 0x13c   : > { %v874_v34 = vsel %vm831_vm7, %v3051_v63, 0.0  ;;  %vm909_vm9 = vcmp.eq.s32.totalorder %v3388_v57, %v2981_v39  ;;  %v950_v1 = vsel %vm907_vm8, %v3066_v5, 0.0  ;;  %vm1019_vm10 = vcmp.eq.s32.totalorder %v2963_v25, %v2988_v44 }
 0x13d   : > { %vm1021_vm11 = vcmp.eq.s32.totalorder %v3388_v57, %v2988_v44  ;;  %v1257_v53 = vand.u32 4294901760, %v1205_v20  ;;  %v1261_v56 = vand.u32 4294901760, %v1207_v40  ;;  %v952_v60 = vsel %vm909_vm9, %v3066_v5, 0.0 }
 0x13e   : > { %v982_v47 = vadd.f32 %v950_v1, %v872_v14  ;;  %v3458_v3 = vsub.f32 %v1202_v35, %v1255_v13  ;;  %v984_v32 = vadd.f32 %v952_v60, %v874_v34  ;;  %v1062_v22 = vsel %vm1019_vm10, %v3080_v10, 0.0 }
 0x13f   : > { %v1064_v46 = vsel %vm1021_vm11, %v3080_v10, 0.0  ;;  %v3462_v17 = vpack.c.bf16 %v1261_v56, %v1257_v53  ;;  %v3464_v4 = vsub.f32 %v1205_v20, %v1257_v53  ;;  %vm1129_vm12 = vcmp.eq.s32.totalorder %v2963_v25, %v2991_v45 }
 0x140   : > { %v1094_v36 = vadd.f32 %v1062_v22, %v982_v47  ;;  %v1096_v11 = vadd.f32 %v1064_v46, %v984_v32  ;;  %vm1131_vm13 = vcmp.eq.s32.totalorder %v3388_v57, %v2991_v45  ;;  %v1172_v35 = vsel %vm1129_vm12, %v3085_v12, 0.0 }
 0x141   : > { %3938 = vst [vmem:[#allocation25_spill] sm:$0xff] %v3462_v17  ;;  %v800_v13 = vadd.s32 96, %v2747_v43  ;;  %2303 = vmatprep.subr.bf16.mxu1 %v3462_v17  ;;  %v3473_v14 = vsub.f32 %v1207_v40, %v1261_v56  ;;  %2399 = vmatprep.subr.bf16.mxu0 %v3462_v17  ;;  %v1174_v20 = vsel %vm1131_vm13, %v3085_v12, 0.0  ;;  %v801_v1 = vadd.s32 104, %v2747_v43 }
 0x142   : > { %v1204_v34 = vadd.f32 %v1172_v35, %v1094_v36  ;;  %v1206_v25 = vadd.f32 %v1174_v20, %v1096_v11  ;;  %v3481_v46 = vadd.s32 112, %v2747_v43 }
 0x143   : > { %vm834_vm14 = vcmp.eq.s32.totalorder %v800_v13, %v2957_v23  ;;  %vm912_vm15 = vcmp.eq.s32.totalorder %v800_v13, %v2960_v24  ;;  %vm836_vm0 = vcmp.eq.s32.totalorder %v801_v1, %v2957_v23  ;;  %vm914_vm1 = vcmp.eq.s32.totalorder %v801_v1, %v2960_v24 }
 0x144   : > { %v1259_v57 = vand.u32 4294901760, %v1204_v34  ;;  %v877_v40 = vsel %vm834_vm14, %v3032_v58, 0.0  ;;  %v1263_v53 = vand.u32 4294901760, %v1206_v25  ;;  %v879_v36 = vsel %vm836_vm0, %v3032_v58, 0.0 }
 0x145   : > { %v955_v56 = vsel %vm912_vm15, %v3035_v59, 0.0  ;;  %v957_v11 = vsel %vm914_vm1, %v3035_v59, 0.0  ;;  %vm1024_vm2 = vcmp.eq.s32.totalorder %v800_v13, %v2974_v28  ;;  %vm1026_vm3 = vcmp.eq.s32.totalorder %v801_v1, %v2974_v28 }
 0x146   : > { %v987_v60 = vadd.f32 %v955_v56, %v877_v40  ;;  %v989_v47 = vadd.f32 %v957_v11, %v879_v36  ;;  %v3491_v32 = vpack.c.bf16 %v1263_v53, %v1259_v57  ;;  %v3493_v22 = vsub.f32 %v1204_v34, %v1259_v57 }
 0x147   : > { %v1067_v35 = vsel %vm1024_vm2, %v3042_v62, 0.0  ;;  %v1069_v20 = vsel %vm1026_vm3, %v3042_v62, 0.0  ;;  %vm1134_vm4 = vcmp.eq.s32.totalorder %v800_v13, %v2984_v41  ;;  %vm1136_vm5 = vcmp.eq.s32.totalorder %v801_v1, %v2984_v41 }
 0x148   : > { %3939 = vst [vmem:[#allocation26_spill] sm:$0xff] %v3491_v32  ;;  %v1099_v17 = vadd.f32 %v1067_v35, %v987_v60  ;;  %v1101_v30 = vadd.f32 %v1069_v20, %v989_v47  ;;  %2305 = vmatpush1.bf16.msra.mxu1 %v3491_v32  ;;  %2401 = vmatpush1.bf16.msra.mxu0 %v3491_v32  ;;  %v1177_v40 = vsel %vm1134_vm4, %v3069_v6, 0.0  ;;  %v1179_v36 = vsel %vm1136_vm5, %v3069_v6, 0.0 }
 0x149   : > { %vm833_vm6 = vcmp.eq.s32.totalorder %v800_v13, %v2971_v27  ;;  %vm835_vm7 = vcmp.eq.s32.totalorder %v801_v1, %v2971_v27  ;;  %v3507_v60 = vsub.f32 %v1206_v25, %v1263_v53  ;;  %vm911_vm8 = vcmp.eq.s32.totalorder %v800_v13, %v2981_v39 }
 0x14a   : > { %v1209_v34 = vadd.f32 %v1177_v40, %v1099_v17  ;;  %v1211_v57 = vadd.f32 %v1179_v36, %v1101_v30  ;;  %v876_v56 = vsel %vm833_vm6, %v3051_v63, 0.0  ;;  %v878_v11 = vsel %vm835_vm7, %v3051_v63, 0.0 }
 0x14b   : > { %vm913_vm9 = vcmp.eq.s32.totalorder %v801_v1, %v2981_v39  ;;  %vm1023_vm10 = vcmp.eq.s32.totalorder %v800_v13, %v2988_v44  ;;  %v954_v20 = vsel %vm911_vm8, %v3066_v5, 0.0  ;;  %vm1025_vm11 = vcmp.eq.s32.totalorder %v801_v1, %v2988_v44 }
 0x14c   : > { %v1265_v47 = vand.u32 4294901760, %v1209_v34  ;;  %v1269_v35 = vand.u32 4294901760, %v1211_v57  ;;  %v956_v32 = vsel %vm913_vm9, %v3066_v5, 0.0  ;;  %v986_v17 = vadd.f32 %v954_v20, %v876_v56 }
 0x14d   : > { %v988_v30 = vadd.f32 %v956_v32, %v878_v11  ;;  %v1066_v40 = vsel %vm1023_vm10, %v3080_v10, 0.0  ;;  %v1068_v36 = vsel %vm1025_vm11, %v3080_v10, 0.0  ;;  %vm1133_vm12 = vcmp.eq.s32.totalorder %v800_v13, %v2991_v45 }
 0x14e   : > { %v3516_v25 = vpack.c.bf16 %v1269_v35, %v1265_v47  ;;  %v3518_v53 = vsub.f32 %v1209_v34, %v1265_v47  ;;  %v1098_v19 = vadd.f32 %v1066_v40, %v986_v17  ;;  %vm1135_vm13 = vcmp.eq.s32.totalorder %v801_v1, %v2991_v45 }
 0x14f   : > { %v1100_v16 = vadd.f32 %v1068_v36, %v988_v30  ;;  %v1176_v15 = vsel %vm1133_vm12, %v3085_v12, 0.0  ;;  %v1178_v32 = vsel %vm1135_vm13, %v3085_v12, 0.0  ;;  %v803_v56 = vadd.s32 120, %v2747_v43 }
 0x150   : > { %2307 = vmatprep.subr.bf16.mxu1 %v3516_v25  ;;  %2403 = vmatprep.subr.bf16.mxu0 %v3516_v25  ;;  %vm838_vm14 = vcmp.eq.s32.totalorder %v3481_v46, %v2957_v23  ;;  %vm916_vm15 = vcmp.eq.s32.totalorder %v3481_v46, %v2960_v24  ;;  %v1208_v13 = vadd.f32 %v1176_v15, %v1098_v19 }
 0x151   : > { %v1210_v34 = vadd.f32 %v1178_v32, %v1100_v16  ;;  %v881_v1 = vsel %vm838_vm14, %v3032_v58, 0.0  ;;  %v959_v11 = vsel %vm916_vm15, %v3035_v59, 0.0  ;;  %vm840_vm0 = vcmp.eq.s32.totalorder %v803_v56, %v2957_v23 }
 0x152   : > { %vm918_vm1 = vcmp.eq.s32.totalorder %v803_v56, %v2960_v24  ;;  %v991_v47 = vadd.f32 %v959_v11, %v881_v1  ;;  %vm1028_vm2 = vcmp.eq.s32.totalorder %v3481_v46, %v2974_v28  ;;  %v1267_v20 = vand.u32 4294901760, %v1208_v13 }
 0x153   : > { %v1271_v17 = vand.u32 4294901760, %v1210_v34  ;;  %v883_v30 = vsel %vm840_vm0, %v3032_v58, 0.0  ;;  %v961_v40 = vsel %vm918_vm1, %v3035_v59, 0.0  ;;  %v3540_v15 = vsub.f32 %v1211_v57, %v1269_v35 }
 0x154   : > { %v993_v16 = vadd.f32 %v961_v40, %v883_v30  ;;  %vm1030_vm3 = vcmp.eq.s32.totalorder %v803_v56, %v2974_v28  ;;  %v1071_v19 = vsel %vm1028_vm2, %v3042_v62, 0.0  ;;  %v3546_v24 = vsub.f32 %v1208_v13, %v1267_v20 }
 0x155   : > { %v3544_v23 = vpack.c.bf16 %v1271_v17, %v1267_v20  ;;  %v1073_v36 = vsel %vm1030_vm3, %v3042_v62, 0.0  ;;  %vm1138_vm4 = vcmp.eq.s32.totalorder %v3481_v46, %v2984_v41  ;;  %v1103_v32 = vadd.f32 %v1071_v19, %v991_v47 }
 0x156   : > { %v1105_v58 = vadd.f32 %v1073_v36, %v993_v16  ;;  %vm1140_vm5 = vcmp.eq.s32.totalorder %v803_v56, %v2984_v41  ;;  %v1181_v59 = vsel %vm1138_vm4, %v3069_v6, 0.0  ;;  %vm837_vm6 = vcmp.eq.s32.totalorder %v3481_v46, %v2971_v27 }
 0x157   : > { %2309 = vmatpush1.bf16.msra.mxu1 %v3544_v23  ;;  %2405 = vmatpush1.bf16.msra.mxu0 %v3544_v23  ;;  %v1183_v28 = vsel %vm1140_vm5, %v3069_v6, 0.0  ;;  %vm839_vm7 = vcmp.eq.s32.totalorder %v803_v56, %v2971_v27  ;;  %vm915_vm8 = vcmp.eq.s32.totalorder %v3481_v46, %v2981_v39  ;;  %v1213_v62 = vadd.f32 %v1181_v59, %v1103_v32 }
 0x158   : > { %v1215_v57 = vadd.f32 %v1183_v28, %v1105_v58  ;;  %v880_v41 = vsel %vm837_vm6, %v3051_v63, 0.0  ;;  %v882_v35 = vsel %vm839_vm7, %v3051_v63, 0.0  ;;  %vm917_vm9 = vcmp.eq.s32.totalorder %v803_v56, %v2981_v39 }
 0x159   : > { %v958_v13 = vsel %vm915_vm8, %v3066_v5, 0.0  ;;  %vm1027_vm10 = vcmp.eq.s32.totalorder %v3481_v46, %v2988_v44  ;;  %vm1029_vm11 = vcmp.eq.s32.totalorder %v803_v56, %v2988_v44  ;;  %v1273_v6 = vand.u32 4294901760, %v1213_v62  ;;  %v1216_v44 = vld [vmem:[%s3876_s2] sm:$0xff] }
 0x15a   : > { %v1277_v27 = vand.u32 4294901760, %v1215_v57  ;;  %v960_v1 = vsel %vm917_vm9, %v3066_v5, 0.0  ;;  %v990_v11 = vadd.f32 %v958_v13, %v880_v41  ;;  %v3569_v47 = vsub.f32 %v1210_v34, %v1271_v17 }
 0x15b   : > { %v992_v20 = vadd.f32 %v960_v1, %v882_v35  ;;  %v1070_v30 = vsel %vm1027_vm10, %v3080_v10, 0.0  ;;  %v1072_v63 = vsel %vm1029_vm11, %v3080_v10, 0.0  ;;  %v3575_v40 = vsub.f32 %v1213_v62, %v1273_v6 }
 0x15c   : > { %v3573_v39 = vpack.c.bf16 %v1277_v27, %v1273_v6  ;;  %v1102_v16 = vadd.f32 %v1070_v30, %v990_v11  ;;  %vm1137_vm12 = vcmp.eq.s32.totalorder %v3481_v46, %v2991_v45  ;;  %vm1139_vm13 = vcmp.eq.s32.totalorder %v803_v56, %v2991_v45 }
 0x15d   : > { %v1104_v5 = vadd.f32 %v1072_v63, %v992_v20  ;;  %v1180_v34 = vsel %vm1137_vm12, %v3085_v12, 0.0  ;;  %v1327_v17 = vand.u32 4294901760, %v3153_v7  ;;  %v1182_v10 = vsel %vm1139_vm13, %v3085_v12, 0.0 }
 0x15e   : > { %2311 = vmatprep.subr.bf16.mxu1 %v3573_v39  ;;  %2407 = vmatprep.subr.bf16.mxu0 %v3573_v39  ;;  %v1212_v19 = vadd.f32 %v1180_v34, %v1102_v16  ;;  %v1339_v46 = vand.u32 4294901760, %v3155_v51  ;;  %v3904_v58 = vmov 0.0   ;;  %v3594_v45 = vand.u32 4294901760, %v1216_v44 }
 0x15f   : > { %v3589_v36 = vadd.f32 %v1182_v10, %v1104_v5  ;;  %v1328_v32 = vsub.f32 %v3153_v7, %v1327_v17  ;;  %1313 = vmatprep.mubr.f32.mxu1 %v3904_v58  ;;  %1790 = vmatprep.mubr.f32.mxu0 %v3904_v58  ;;  %v1333_v56 = vand.u32 4294901760, %v3183_v37  ;;  %v1345_v62 = vand.u32 4294901760, %v3185_v42 }
 0x160   : > { %v1275_v59 = vand.u32 4294901760, %v1212_v19  ;;  %v1340_v28 = vsub.f32 %v3155_v51, %v1339_v46  ;;  %v2410_v12 = vpack.c.bf16 %v1339_v46, %v1327_v17  ;;  %v3601_v13 = vsub.f32 %v1216_v44, %v3594_v45 }
 0x161   : > { %v3903_v41 = vand.u32 4294901760, %v3589_v36  ;;  %v1329_v35 = vand.u32 4294901760, %v1328_v32  ;;  %v1334_v6 = vsub.f32 %v3183_v37, %v1333_v56  ;;  %v3604_v1 = vsub.f32 %v1215_v57, %v1277_v27 }
 0x162   : > { %3940 = vst [vmem:[#allocation27_spill] sm:$0xff] %v3601_v13  ;;  %v1341_v11 = vand.u32 4294901760, %v1340_v28  ;;  %v1346_v20 = vsub.f32 %v3185_v42, %v1345_v62  ;;  %v2412_v30 = vpack.c.bf16 %v1345_v62, %v1333_v56  ;;  %v3611_v16 = vsub.f32 %v1212_v19, %v1275_v59 }
 0x163   : > { %v3609_v63 = vpack.c.bf16 %v3903_v41, %v1275_v59  ;;  %v1316_v5 = vand.u32 4294901760, %v3601_v13  ;;  %v1335_v34 = vand.u32 4294901760, %v1334_v6  ;;  %v1351_v10 = vand.u32 4294901760, %v3201_v55 }
 0x164   : > { %v2314_v17 = vpack.c.bf16 %v1341_v11, %v1329_v35  ;;  %v1347_v44 = vand.u32 4294901760, %v1346_v20  ;;  %v1363_v57 = vand.u32 4294901760, %v3207_v54  ;;  %v1357_v46 = vand.u32 4294901760, %v3233_v8 }
 0x165   : > { %2313 = vmatpush1.bf16.msra.mxu1 %v3609_v63  ;;  %2409 = vmatpush1.bf16.msra.mxu0 %v3609_v63  ;;  %v1317_v27 = vsub.f32 %v3601_v13, %v1316_v5  ;;  %v1369_v19 = vand.u32 4294901760, %v3241_v61  ;;  %v1375_v32 = vand.u32 4294901760, %v3266_v9  ;;  %v1352_v59 = vsub.f32 %v3201_v55, %v1351_v10 }
 0x166   : > { %2315 = vmatprep.subr.bf16.mxu1 %v2314_v17  ;;  %2411 = vmatprep.subr.bf16.mxu0 %v2410_v12  ;;  %v2316_v56 = vpack.c.bf16 %v1347_v44, %v1335_v34  ;;  %v1364_v28 = vsub.f32 %v3207_v54, %v1363_v57  ;;  %v1387_v62 = vand.u32 4294901760, %v3275_v18  ;;  %v2414_v6 = vpack.c.bf16 %v1363_v57, %v1351_v10 }
 0x167   : > { %v1318_v35 = vand.u32 4294901760, %v1317_v27  ;;  %v1358_v11 = vsub.f32 %v3233_v8, %v1357_v46  ;;  %v1370_v20 = vsub.f32 %v3241_v61, %v1369_v19  ;;  %v1353_v41 = vand.u32 4294901760, %v1352_v59 }
 0x168   : > { %1794 = vmatmul.mubr.f32.vlgmr.msra.gmra.mrb[0].mxu0 %v1316_v5  ;;  %v1365_v58 = vand.u32 4294901760, %v1364_v28  ;;  %v2416_v43 = vpack.c.bf16 %v1369_v19, %v1357_v46  ;;  %v1376_v17 = vsub.f32 %v3266_v9, %v1375_v32  ;;  %v1388_v44 = vsub.f32 %v3275_v18, %v1387_v62 }
 0x169   : > { %1319 = vmatmul.mubr.f32.vlgmr.msra.gmra.mrb[0].mxu1 %v1318_v35  ;;  %2413 = vmatpush1.bf16.msra.mxu0 %v2412_v30  ;;  %v1359_v12 = vand.u32 4294901760, %v1358_v11  ;;  %v1371_v34 = vand.u32 4294901760, %v1370_v20  ;;  %v2418_v13 = vpack.c.bf16 %v1387_v62, %v1375_v32  ;;  %v1381_v57 = vand.u32 4294901760, %v3301_v29 }
 0x16a   : > { %2317 = vmatpush1.bf16.msra.mxu1 %v2316_v56  ;;  %v2318_v27 = vpack.c.bf16 %v1365_v58, %v1353_v41  ;;  %2415 = vmatprep.subr.bf16.mxu0 %v2414_v6  ;;  %v1377_v10 = vand.u32 4294901760, %v1376_v17  ;;  %v1393_v5 = vand.u32 4294901760, %v3303_v21  ;;  %v1389_v28 = vand.u32 4294901760, %v1388_v44 }
 0x16b   : > { %v2320_v59 = vpack.c.bf16 %v1371_v34, %v1359_v12  ;;  %v1399_v46 = vand.u32 4294901760, %v3335_v38  ;;  %v1411_v19 = vand.u32 4294901760, %v3337_v2  ;;  %v3941_v30 = vmov 0.0  }
 0x16c   : > { %1549 = vmatprep.mubr.f32.mxu1 %v3941_v30  ;;  %1960 = vmatprep.mubr.f32.mxu0 %v3941_v30  ;;  %v1382_v32 = vsub.f32 %v3301_v29, %v1381_v57  ;;  %v1394_v58 = vsub.f32 %v3303_v21, %v1393_v5  ;;  %v2420_v41 = vpack.c.bf16 %v1393_v5, %v1381_v57  ;;  %v1405_v56 = vand.u32 4294901760, %v3361_v31 }
 0x16d   : > { %2319 = vmatprep.subr.bf16.mxu1 %v2318_v27  ;;  %2417 = vmatpush1.bf16.msra.mxu0 %v2416_v43  ;;  %v2322_v62 = vpack.c.bf16 %v1389_v28, %v1377_v10  ;;  %v1400_v35 = vsub.f32 %v3335_v38, %v1399_v46  ;;  %v1412_v6 = vsub.f32 %v3337_v2, %v1411_v19  ;;  %v1417_v34 = vand.u32 4294901760, %v3369_v48 }
 0x16e   : > { %v2422_v11 = vpack.c.bf16 %v1411_v19, %v1399_v46  ;;  %2321 = vmatpush1.bf16.msra.mxu1 %v2320_v59  ;;  %2419 = vmatprep.subr.bf16.mxu0 %v2418_v13  ;;  %v1383_v20 = vand.u32 4294901760, %v1382_v32  ;;  %v1395_v17 = vand.u32 4294901760, %v1394_v58  ;;  %v1406_v12 = vsub.f32 %v3361_v31, %v1405_v56 }
 0x16f   : > { %2323 = vmatprep.subr.bf16.mxu1 %v2322_v62  ;;  %v1401_v44 = vand.u32 4294901760, %v1400_v35  ;;  %v1413_v27 = vand.u32 4294901760, %v1412_v6  ;;  %v1423_v57 = vand.u32 4294901760, %v3396_v49  ;;  %v1435_v43 = vand.u32 4294901760, %v3416_v0 }
 0x170   : > { %v2324_v10 = vpack.c.bf16 %v1395_v17, %v1383_v20  ;;  %v1407_v5 = vand.u32 4294901760, %v1406_v12  ;;  %v1418_v28 = vsub.f32 %v3369_v48, %v1417_v34  ;;  %v2424_v46 = vpack.c.bf16 %v1417_v34, %v1405_v56 }
 0x171   : > { %v3942_v13 = vand.u32 4294901760, %v3589_v36  ;;  %2421 = vmatpush1.bf16.msra.mxu0 %v2420_v41  ;;  %v2326_v19 = vpack.c.bf16 %v1413_v27, %v1401_v44  ;;  %v1424_v32 = vsub.f32 %v3396_v49, %v1423_v57  ;;  %v1436_v58 = vsub.f32 %v3416_v0, %v1435_v43 }
 0x172   : > { %2325 = vmatpush1.bf16.msra.mxu1 %v2324_v10  ;;  %2423 = vmatprep.subr.bf16.mxu0 %v2422_v11  ;;  %v1419_v62 = vand.u32 4294901760, %v1418_v28  ;;  %v1429_v35 = vand.u32 4294901760, %v3431_v52  ;;  %v1441_v6 = vand.u32 4294901760, %v3458_v3  ;;  %v1447_v56 = vand.u32 4294901760, %v3464_v4 }
 0x173   : > { %v3648_v59 = vsub.f32 %v3589_v36, %v3942_v13  ;;  %2327 = vmatprep.subr.bf16.mxu1 %v2326_v19  ;;  %v1425_v20 = vand.u32 4294901760, %v1424_v32  ;;  %v1437_v17 = vand.u32 4294901760, %v1436_v58  ;;  %v1459_v36 = vand.u32 4294901760, %v3473_v14 }
 0x174   : > { %v1453_v41 = vand.u32 4294901760, %v3493_v22  ;;  %v2328_v12 = vpack.c.bf16 %v1419_v62, %v1407_v5  ;;  %v2426_v34 = vpack.c.bf16 %v1435_v43, %v1423_v57  ;;  %v1430_v44 = vsub.f32 %v3431_v52, %v1429_v35 }
 0x175   : > { %v1442_v11 = vsub.f32 %v3458_v3, %v1441_v6  ;;  %2425 = vmatpush1.bf16.msra.mxu0 %v2424_v46  ;;  %v2330_v27 = vpack.c.bf16 %v1437_v17, %v1425_v20  ;;  %v2428_v10 = vpack.c.bf16 %v1441_v6, %v1429_v35  ;;  %v1448_v28 = vsub.f32 %v3464_v4, %v1447_v56 }
 0x176   : > { %v1460_v13 = vsub.f32 %v3473_v14, %v1459_v36  ;;  %2329 = vmatpush1.bf16.msra.mxu1 %v2328_v12  ;;  %2427 = vmatprep.subr.bf16.mxu0 %v2426_v34  ;;  %v1431_v19 = vand.u32 4294901760, %v1430_v44  ;;  %v1454_v58 = vsub.f32 %v3493_v22, %v1453_v41  ;;  %v1465_v5 = vand.u32 4294901760, %v3507_v60 }
 0x177   : > { %v1443_v32 = vand.u32 4294901760, %v1442_v11  ;;  %2331 = vmatprep.subr.bf16.mxu1 %v2330_v27  ;;  %v1449_v57 = vand.u32 4294901760, %v1448_v28  ;;  %v1471_v62 = vand.u32 4294901760, %v3518_v53  ;;  %v1483_v46 = vand.u32 4294901760, %v3540_v15 }
 0x178   : > { %v1461_v43 = vand.u32 4294901760, %v1460_v13  ;;  %v2430_v6 = vpack.c.bf16 %v1459_v36, %v1447_v56  ;;  %v1455_v20 = vand.u32 4294901760, %v1454_v58  ;;  %v1466_v17 = vsub.f32 %v3507_v60, %v1465_v5 }
 0x179   : > { %v2332_v35 = vpack.c.bf16 %v1443_v32, %v1431_v19  ;;  %2429 = vmatpush1.bf16.msra.mxu0 %v2428_v10  ;;  %v2432_v34 = vpack.c.bf16 %v1465_v5, %v1453_v41  ;;  %v1472_v44 = vsub.f32 %v3518_v53, %v1471_v62  ;;  %v1484_v11 = vsub.f32 %v3540_v15, %v1483_v46 }
 0x17a   : > { %v2334_v12 = vpack.c.bf16 %v1461_v43, %v1449_v57  ;;  %2431 = vmatprep.subr.bf16.mxu0 %v2430_v6  ;;  %v1467_v27 = vand.u32 4294901760, %v1466_v17  ;;  %v1477_v28 = vand.u32 4294901760, %v3546_v24  ;;  %v1489_v13 = vand.u32 4294901760, %v3569_v47 }
 0x17b   : > { %2333 = vmatpush1.bf16.msra.mxu1 %v2332_v35  ;;  %v1495_v19 = vand.u32 4294901760, %v3575_v40  ;;  %v1473_v56 = vand.u32 4294901760, %v1472_v44  ;;  %v1485_v36 = vand.u32 4294901760, %v1484_v11  ;;  %v1507_v10 = vand.u32 4294901760, %v3604_v1 }
 0x17c   : > { %2335 = vmatprep.subr.bf16.mxu1 %v2334_v12  ;;  %v1501_v41 = vand.u32 4294901760, %v3611_v16  ;;  %v2336_v32 = vpack.c.bf16 %v1467_v27, %v1455_v20  ;;  %v2434_v58 = vpack.c.bf16 %v1483_v46, %v1471_v62  ;;  %v1478_v5 = vsub.f32 %v3546_v24, %v1477_v28 }
 0x17d   : > { %v1490_v57 = vsub.f32 %v3569_v47, %v1489_v13  ;;  %2433 = vmatpush1.bf16.msra.mxu0 %v2432_v34  ;;  %v2338_v43 = vpack.c.bf16 %v1485_v36, %v1473_v56  ;;  %v2436_v35 = vpack.c.bf16 %v1489_v13, %v1477_v28  ;;  %v1496_v6 = vsub.f32 %v3575_v40, %v1495_v19 }
 0x17e   : > { %v1508_v17 = vsub.f32 %v3604_v1, %v1507_v10  ;;  %2435 = vmatprep.subr.bf16.mxu0 %v2434_v58  ;;  %v1479_v12 = vand.u32 4294901760, %v1478_v5  ;;  %v1502_v11 = vsub.f32 %v3611_v16, %v1501_v41  ;;  %v1513_v20 = vand.u32 4294901760, %v3648_v59 }
 0x17f   : > { %2337 = vmatpush1.bf16.msra.mxu1 %v2336_v32  ;;  %v1491_v44 = vand.u32 4294901760, %v1490_v57  ;;  %v1497_v62 = vand.u32 4294901760, %v1496_v6  ;;  %v2346_v34 = vpack.c.bf16 %v3155_v51, %v3153_v7  ;;  %v2348_v27 = vpack.c.bf16 %v3185_v42, %v3183_v37 }
 0x180   : > { %2339 = vmatprep.subr.bf16.mxu1 %v2338_v43  ;;  %v1509_v46 = vand.u32 4294901760, %v1508_v17  ;;  %v2438_v13 = vpack.c.bf16 %v1507_v10, %v1495_v19  ;;  %v1503_v56 = vand.u32 4294901760, %v1502_v11  ;;  %v1514_v36 = vsub.f32 %v3648_v59, %v1513_v20 }
 0x181   : > { %v2340_v28 = vpack.c.bf16 %v1491_v44, %v1479_v12  ;;  %2437 = vmatpush1.bf16.msra.mxu0 %v2436_v35  ;;  %v2350_v58 = vpack.c.bf16 %v3207_v54, %v3201_v55  ;;  %v2352_v5 = vpack.c.bf16 %v3241_v61, %v3233_v8  ;;  %v2354_v57 = vpack.c.bf16 %v3275_v18, %v3266_v9  ;;  %v3944_v8 = vld [vmem:[#allocation19_spill] sm:$0xff]  ;;  %v3946_v61 = vld [vmem:[#allocation21_spill] sm:$0xff] }
 0x182   : > { %v2342_v32 = vpack.c.bf16 %v1509_v46, %v1497_v62  ;;  %2439 = vmatprep.subr.bf16.mxu0 %v2438_v13  ;;  %v1515_v7 = vand.u32 4294901760, %v1514_v36  ;;  %v2356_v51 = vpack.c.bf16 %v3303_v21, %v3301_v29  ;;  %v2358_v37 = vpack.c.bf16 %v3337_v2, %v3335_v38  ;;  %v3943_v2 = vld [vmem:[#allocation18_spill] sm:$0xff]  ;;  %v3948_v9 = vld [vmem:[#allocation23_spill] sm:$0xff]  ;;  %v3949_v29 = vld [vmem:[#allocation24_spill] sm:$0xff] }
 0x183   : > { %2341 = vmatpush1.bf16.msra.mxu1 %v2340_v28  ;;  %v2360_v42 = vpack.c.bf16 %v3369_v48, %v3361_v31  ;;  %v2440_v55 = vpack.c.bf16 %v1513_v20, %v1501_v41  ;;  %v2364_v18 = vpack.c.bf16 %v3458_v3, %v3431_v52  ;;  %v2366_v21 = vpack.c.bf16 %v3473_v14, %v3464_v4  ;;  %v3950_v38 = vld [vmem:[#allocation25_spill] sm:$0xff]  ;;  %v3951_v48 = vld [vmem:[#allocation26_spill] sm:$0xff]  ;;  %v3952_v3 = vld [vmem:[#allocation27_spill] sm:$0xff] }
 0x184   : > { %2343 = vmatprep.subr.bf16.mxu1 %v2342_v32  ;;  %v2344_v54 = vpack.c.bf16 %v1515_v7, %v1503_v56  ;;  %v2368_v31 = vpack.c.bf16 %v3507_v60, %v3493_v22  ;;  %v2374_v4 = vpack.c.bf16 %v3604_v1, %v3575_v40  ;;  %v2376_v52 = vpack.c.bf16 %v3648_v59, %v3611_v16  ;;  %v3953_v22 = vld [vmem:[#allocation8_spill] sm:$0xff]  ;;  %v245_v1 = vpop.permute.xlu0 %244 }
 0x185   : > { %2441 = vmatpush1.bf16.msra.mxu0 %v2440_v55  ;;  %v233_v14 = vstv %s2256_s29 }
 0x186   : > { %2443 = vmatprep.subr.bf16.mxu0 %v3151_v50  ;;  %v3945_v50 = vld [vmem:[#allocation20_spill] sm:$0xff]  ;;  %v234_v60 = vadd.f32 %v233_v14, %v3953_v22 }
 0x187   : > { %2345 = vmatpush1.bf16.msra.mxu1 %v2344_v54 }
 0x188   : > { %2347 = vmatprep.subr.bf16.mxu1 %v2346_v34  ;;  %1962 = vmatmul.mubr.f32.vlgmr.msra.gmra.mrb[0].mxu0 %v3594_v45 }
 0x189   : > { %2445 = vmatpush1.bf16.msra.mxu0 %v3181_v26  ;;  %2064 = vmatprep.mubr.f32.mxu0 %v3941_v30  ;;  %v3947_v26 = vld [vmem:[#allocation22_spill] sm:$0xff] }
 0x18a   : > { %1551 = vmatmul.mubr.f32.vlgmr.msra.gmra.mrb[0].mxu1 %v3594_v45  ;;  %2447 = vmatprep.subr.bf16.mxu0 %v3205_v33  ;;  %v2362_v33 = vpack.c.bf16 %v3416_v0, %v3396_v49  ;;  %v2370_v49 = vpack.c.bf16 %v3540_v15, %v3518_v53  ;;  %v2372_v0 = vpack.c.bf16 %v3569_v47, %v3546_v24  ;;  %v3954_v24 = vld [vmem:[#allocation10_spill] sm:$0xff] }
 0x18b   : > { %2349 = vmatpush1.bf16.msra.mxu1 %v2348_v27  ;;  %1685 = vmatprep.mubr.f32.mxu1 %v3941_v30 }
 0x18c   : > { %2351 = vmatprep.subr.bf16.mxu1 %v2350_v58 }
 0x18d   : > { %2449 = vmatpush1.bf16.msra.mxu0 %v3943_v2 }
 0x18e   : > { %2451 = vmatprep.subr.bf16.mxu0 %v3944_v8 }
 0x18f   : > { %2353 = vmatpush1.bf16.msra.mxu1 %v2352_v5  ;;  %v3957_v5 = vld [vmem:[#allocation9_spill] sm:$0xff] }
 0x190   : > { %2355 = vmatprep.subr.bf16.mxu1 %v2354_v57  ;;  %v3958_v57 = vld [vmem:[#allocation12_spill] sm:$0xff] }
 0x191   : > { %2453 = vmatpush1.bf16.msra.mxu0 %v3945_v50 }
 0x192   : > { %2455 = vmatprep.subr.bf16.mxu0 %v3946_v61 }
 0x193   : > { %2357 = vmatpush1.bf16.msra.mxu1 %v2356_v51 }
 0x194   : > { %2359 = vmatprep.subr.bf16.mxu1 %v2358_v37 }
 0x195   : > { %2457 = vmatpush1.bf16.msra.mxu0 %v3947_v26 }
 0x196   : > { %2459 = vmatprep.subr.bf16.mxu0 %v3948_v9 }
 0x197   : > { %2361 = vmatpush1.bf16.msra.mxu1 %v2360_v42 }
 0x198   : > { %2363 = vmatprep.subr.bf16.mxu1 %v2362_v33 }
 0x199   : > { %2461 = vmatpush1.bf16.msra.mxu0 %v3949_v29 }
 0x19a   : > { %2463 = vmatprep.subr.bf16.mxu0 %v3950_v38 }
 0x19b   : > { %2365 = vmatpush1.bf16.msra.mxu1 %v2364_v18 }
 0x19c   : > { %2367 = vmatprep.subr.bf16.mxu1 %v2366_v21 }
 0x19d   : > { %2465 = vmatpush1.bf16.msra.mxu0 %v3951_v48 }
 0x19e   : > { %2467 = vmatprep.subr.bf16.mxu0 %v3516_v25  ;;  %v235_v25 = vmul.f32 1.25, %v234_v60 }
 0x19f   : > { %2369 = vmatpush1.bf16.msra.mxu1 %v2368_v31 }
 0x1a0   : > { %2371 = vmatprep.subr.bf16.mxu1 %v2370_v49  ;;  %v2257_v53 = vclamps-f32 %v235_v25, 1.0 }
 0x1a1   : > { %2469 = vmatpush1.bf16.msra.mxu0 %v3544_v23 }
 0x1a2   : > { %2471 = vmatprep.subr.bf16.mxu0 %v3573_v39  ;;  %v238_v15 = vadd.f32 1.0, %v2257_v53  ;;  %v3955_v39 = vld [vmem:[#allocation11_spill] sm:$0xff] }
 0x1a3   : > { %2373 = vmatpush1.bf16.msra.mxu1 %v2372_v0 }
 0x1a4   : > { %2375 = vmatprep.subr.bf16.mxu1 %v2374_v4  ;;  %v3735_v23 = vmul.f32 0.5, %v238_v15 }
 0x1a5   : > { %2473 = vmatpush1.bf16.msra.mxu0 %v3609_v63  ;;  %v3956_v63 = vmov 0  }
 0x1a6   : > { %v3739_v47 = vrot.slane %v3735_v23, %v3954_v24  ;;  %v3743_v40 = vrot.slane %v3735_v23, %v3955_v39 }
 0x1a7   : > { %2377 = vmatpush1.bf16.msra.mxu1 %v2376_v52 }
 0x1a8   : > { %2066 = vmatmul.mubr.f32.vlgmr.msra.gmra.mrb[0].mxu0 %v3594_v45  ;;  %v250_v45 = vpop.permute.xlu1 %249  ;;  %vm263_vm0 = vcmp.lt.f32.partialorder %v245_v1, %v3739_v47  ;;  %vm264_vm1 = vcmp.lt.f32.partialorder %v245_v1, %v3743_v40 }
 0x1a9   : > { %vm265_vm14 = vcmp.lt.f32.partialorder %v250_v45, %v3739_v47  ;;  %vm266_vm15 = vcmp.lt.f32.partialorder %v250_v45, %v3743_v40  ;;  %v267_v59 = vsel %vm263_vm0, 1, %v3956_v63  ;;  %v268_v19 = vsel %vm264_vm1, 1, %v3956_v63 }
 0x1aa   : > { %1688 = vmatmul.mubr.f32.vlgmr.msra.gmra.mrb[0].mxu1 %v3952_v3  ;;  %v269_v16 = vsel %vm265_vm14, 1, %v3956_v63  ;;  %v270_v30 = vsel %vm266_vm15, 1, %v3956_v63 }
 0x1ab   : > { %v271_v10 = vadd.s32 %v269_v16, %v267_v59  ;;  %v278_v41 = vadd.s32 %v270_v30, %v268_v19 }
 0x1ad   : > { %v272_v43 = vrot.slane %v271_v10, 4  ;;  %v279_v35 = vrot.slane %v278_v41, 4 }
 0x1af   : > { %v273_v6 = vadd.s32 %v272_v43, %v271_v10  ;;  %v280_v17 = vadd.s32 %v279_v35, %v278_v41 }
 0x1b1   : > { %v274_v12 = vrot.slane %v273_v6, 2  ;;  %v281_v44 = vrot.slane %v280_v17, 2 }
 0x1b3   : > { %v282_v11 = vadd.s32 %v281_v44, %v280_v17  ;;  %v275_v20 = vadd.s32 %v274_v12, %v273_v6  ;;  %v3959_v44 = vld [vmem:[#allocation13_spill] sm:$0xff] }
 0x1b5   : > { %v283_v62 = vrot.slane %v282_v11, 1  ;;  %v276_v46 = vrot.slane %v275_v20, 1 }
 0x1b7   : > { %v284_v34 = vadd.s32 %v283_v62, %v282_v11  ;;  %v277_v27 = vadd.s32 %v276_v46, %v275_v20 }
 0x1b9   : > { %vm286_vm2 = vcmp.ge.s32.totalorder %v284_v34, 8  ;;  %vm285_vm3 = vcmp.ge.s32.totalorder %v277_v27, 8 }
 0x1ba   : > { %v3753_v28 = vsel %vm286_vm2, 7, %v284_v34  ;;  %v3755_v13 = vsel %vm285_vm3, 7, %v277_v27 }
 0x1bb   : > { %v2259_v56 = vadd.s32 4294967295, %v3753_v28  ;;  %v2258_v36 = vadd.s32 4294967295, %v3755_v13  ;;  %vm322_vm8 = vcmp.eq.s32.totalorder %v3957_v5, %v3753_v28  ;;  %vm324_vm9 = vcmp.eq.s32.totalorder %v3958_v57, %v3753_v28 }
 0x1bc   : > { %vm321_vm10 = vcmp.eq.s32.totalorder %v3957_v5, %v3755_v13  ;;  %vm323_vm11 = vcmp.eq.s32.totalorder %v3958_v57, %v3755_v13  ;;  %v326_v37 = vsel %vm322_vm8, %v245_v1, 0.0  ;;  %v328_v42 = vsel %vm324_vm9, %v250_v45, 0.0 }
 0x1bd   : > { %vm293_vm4 = vcmp.gt.s32.totalorder %v2259_v56, 0  ;;  %vm291_vm5 = vcmp.gt.s32.totalorder %v2258_v36, 0  ;;  %v325_v55 = vsel %vm321_vm10, %v245_v1, 0.0  ;;  %v327_v54 = vsel %vm323_vm11, %v250_v45, 0.0 }
 0x1be   : > { %v294_v32 = vsel %vm293_vm4, %v2259_v56, 0  ;;  %v292_v58 = vsel %vm291_vm5, %v2258_v36, 0  ;;  %v336_v2 = vadd.f32 %v328_v42, %v326_v37  ;;  %v329_v8 = vadd.f32 %v327_v54, %v325_v55  ;;  %v3960_v42 = vld [vmem:[#allocation16_spill] sm:$0xff]  ;;  %v3961_v55 = vld [vmem:[#allocation17_spill] sm:$0xff] }
 0x1bf   : > { %vm297_vm6 = vcmp.lt.s32.totalorder %v294_v32, 7  ;;  %vm295_vm7 = vcmp.lt.s32.totalorder %v292_v58, 7  ;;  %v598_v54 = vadd.f32 %v3961_v55, %v3960_v42 }
 0x1c0   : > { %v3767_v7 = vsel %vm297_vm6, %v294_v32, 7  ;;  %v3769_v51 = vsel %vm295_vm7, %v292_v58, 7  ;;  %v337_v18 = vrot.slane %v336_v2, 4  ;;  %v330_v21 = vrot.slane %v329_v8, 4 }
 0x1c1   : > { %vm300_vm12 = vcmp.eq.s32.totalorder %v3957_v5, %v3767_v7  ;;  %vm302_vm13 = vcmp.eq.s32.totalorder %v3958_v57, %v3767_v7  ;;  %vm299_vm14 = vcmp.eq.s32.totalorder %v3957_v5, %v3769_v51  ;;  %vm301_vm15 = vcmp.eq.s32.totalorder %v3958_v57, %v3769_v51 }
 0x1c2   : > { %v304_v50 = vsel %vm300_vm12, %v245_v1, 0.0  ;;  %v306_v61 = vsel %vm302_vm13, %v250_v45, 0.0  ;;  %v303_v26 = vsel %vm299_vm14, %v245_v1, 0.0  ;;  %v305_v33 = vsel %vm301_vm15, %v250_v45, 0.0 }
 0x1c3   : > { %v314_v9 = vadd.f32 %v306_v61, %v304_v50  ;;  %v307_v29 = vadd.f32 %v305_v33, %v303_v26  ;;  %v338_v31 = vadd.f32 %v337_v18, %v336_v2  ;;  %v331_v49 = vadd.f32 %v330_v21, %v329_v8  ;;  %v3962_v26 = vld [vmem:[#allocation14_spill] sm:$0xff]  ;;  %v3963_v33 = vld [vmem:[#allocation15_spill] sm:$0xff] }
 0x1c5   : > { %v315_v38 = vrot.slane %v314_v9, 4  ;;  %v308_v48 = vrot.slane %v307_v29, 4  ;;  %v339_v4 = vrot.slane %v338_v31, 2  ;;  %v332_v3 = vrot.slane %v331_v49, 2 }
 0x1c7   : > { %v316_v0 = vadd.f32 %v315_v38, %v314_v9  ;;  %v309_v52 = vadd.f32 %v308_v48, %v307_v29  ;;  %v340_v22 = vadd.f32 %v339_v4, %v338_v31  ;;  %v333_v25 = vadd.f32 %v332_v3, %v331_v49 }
 0x1c8   : > { %v788_v9 = vadd.f32 %v3963_v33, %v3962_v26 }
 0x1c9   : > { %v317_v14 = vrot.slane %v316_v0, 2  ;;  %v310_v60 = vrot.slane %v309_v52, 2  ;;  %v341_v15 = vrot.slane %v340_v22, 1  ;;  %v334_v45 = vrot.slane %v333_v25, 1 }
 0x1cb   : > { %v318_v53 = vadd.f32 %v317_v14, %v316_v0  ;;  %v311_v1 = vadd.f32 %v310_v60, %v309_v52  ;;  %v342_v30 = vadd.f32 %v341_v15, %v340_v22  ;;  %v335_v19 = vadd.f32 %v334_v45, %v333_v25 }
 0x1cd   : > { %v319_v16 = vrot.slane %v318_v53, 1  ;;  %v312_v59 = vrot.slane %v311_v1, 1  ;;  %v364_v41 = vsub.f32 %v342_v30, %v3743_v40  ;;  %v363_v35 = vsub.f32 %v335_v19, %v3739_v47 }
 0x1cf   : > { %v320_v10 = vadd.f32 %v319_v16, %v318_v53  ;;  %v313_v43 = vadd.f32 %v312_v59, %v311_v1  ;;  %v365_v17 = vmax.f32 %v363_v35, 0.0  ;;  %v366_v12 = vmax.f32 %v364_v41, 0.0 }
 0x1d1   : > { %v345_v6 = vcombine.low %v313_v43, %v320_v10  ;;  %vm368_vm0 = vcmp.eq.f32.partialorder %v365_v17, 0.0  ;;  %vm369_vm1 = vcmp.eq.f32.partialorder %v366_v12, 0.0  ;;  %v392_v47 = vcombine.low %v365_v17, %v366_v12 }
 0x1d2   : > { %v370_v20 = vsel %vm368_vm0, 1, %v3956_v63  ;;  %v371_v62 = vsel %vm369_vm1, 1, %v3956_v63 }
 0x1d3   : > { %v352_v11 = vrot.slane %v345_v6, %v3959_v44  ;;  %v372_v34 = vcombine.low %v370_v20, %v371_v62  ;;  %v399_v32 = vrot.slane %v392_v47, %v3959_v44 }
 0x1d5   : > { %v359_v46 = vrot.slane %v352_v11, %v3959_v44  ;;  %v379_v40 = vrot.slane %v372_v34, %v3959_v44  ;;  %v406_v58 = vrot.slane %v399_v32, %v3959_v44 }
 0x1d7   : > { %v361_v27 = vsub.f32 %v3735_v23, %v359_v46  ;;  %v386_v36 = vrot.slane %v379_v40, %v3959_v44  ;;  %v3964_v46 = vlaneseq }
 0x1d9   : > { %v362_v56 = vmax.f32 %v361_v27, 0.0  ;;  %vm387_vm3 = vcmp.ne.s32.totalorder %v386_v36, 0  ;;  %vm2154_vm5 = vcmp.lt.s32.totalorder %v3964_v46, 256 }
 0x1db   : > { %vm367_vm2 = vcmp.eq.f32.partialorder %v362_v56, 0.0 }
 0x1dc   : > { %vm388_vm4 = vmand %vm367_vm2, %vm387_vm3 }
 0x1dd   : > { %v389_v57 = vsel %vm388_vm4, 1.0, %v362_v56  ;;  %v408_v63 = vsel %vm388_vm4, 1.0, %v406_v58 }
 0x1de   : > { %v409_v37 = vadd.f32 %v408_v63, %v389_v57  ;;  %v2076_v2 = vrot.slane %v408_v63, %v3954_v24  ;;  %v2089_v8 = vrot.slane %v389_v57, %v3954_v24  ;;  %v2080_v50 = vrot.slane %v408_v63, %v3955_v39 }
 0x1df   : > { %v2093_v61 = vrot.slane %v389_v57, %v3955_v39 }
 0x1e0   : > { %v599_v23 = vmul.f32 %v598_v54, %v409_v37  ;;  %v2083_v29 = vsel %vm299_vm14, %v2076_v2, 0.0  ;;  %v2096_v21 = vsel %vm321_vm10, %v2089_v8, 0.0  ;;  %v2084_v31 = vsel %vm300_vm12, %v2080_v50, 0.0 }
 0x1e1   : > { %v2097_v48 = vsel %vm322_vm8, %v2093_v61, 0.0  ;;  %v2098_v52 = vadd.f32 %v2096_v21, %v2083_v29 }
 0x1e2   : > { %v789_v18 = vmul.f32 %v788_v9, %v599_v23  ;;  %v2099_v14 = vadd.f32 %v2097_v48, %v2084_v31 }
 0x1e4   : > { %2539 = vrcp.f32 %v789_v18 }
 0x1ee   : > { %v2540_v28 = vpop.eup %2539 }
 0x1ef   : > { %v2119_v19 = vrot.slane %v2540_v28, %v3954_v24  ;;  %v2123_v41 = vrot.slane %v2540_v28, %v3955_v39 }
 0x27b   : > { %v2067_v38 = vpop.f32.mrb[0].mxu0 }
 0x27c   : > { %v2069_v0 = vpop.f32.mrb[1].mxu0 }
 0x27d   : > { %v1689_v49 = vpop.f32.mrb[0].mxu1 }
 0x27e   : > { %v2474_v4 = vadd.f32 %v2067_v38, %v1689_v49  ;;  %v1691_v3 = vpop.f32.mrb[1].mxu1 }
 0x27f   : > { %v2475_v51 = vadd.f32 %v2069_v0, %v1691_v3 }
 0x280   : > { %v2100_v22 = vmul.f32 %v2474_v4, %v2098_v52 }
 0x281   : > { %v2101_v13 = vmul.f32 %v2475_v51, %v2099_v14 }
 0x282   : > { %v2102_v60 = vrot.slane %v2100_v22, 4 }
 0x283   : > { %v2108_v25 = vrot.slane %v2101_v13, 4 }
 0x284   : > { %v2103_v53 = vadd.f32 %v2102_v60, %v2100_v22 }
 0x285   : > { %v2109_v7 = vadd.f32 %v2108_v25, %v2101_v13 }
 0x286   : > { %v2104_v15 = vrot.slane %v2103_v53, 2 }
 0x287   : > { %v2110_v1 = vrot.slane %v2109_v7, 2 }
 0x288   : > { %v2105_v45 = vadd.f32 %v2104_v15, %v2103_v53 }
 0x289   : > { %v2111_v5 = vadd.f32 %v2110_v1, %v2109_v7 }
 0x28a   : > { %v2106_v16 = vrot.slane %v2105_v45, 1 }
 0x28b   : > { %v2112_v30 = vrot.slane %v2111_v5, 1 }
 0x28c   : > { %v2107_v59 = vadd.f32 %v2106_v16, %v2105_v45 }
 0x28d   : > { %v2113_v10 = vadd.f32 %v2112_v30, %v2111_v5 }
 0x28e   : > { %v2126_v43 = vmul.f32 %v2119_v19, %v2107_v59 }
 0x28f   : > { %v2127_v35 = vmul.f32 %v2123_v41, %v2113_v10 }
 0x290   : > { %v2274_v6 = vclamps-f32 %v2126_v43, 1.5 }
 0x291   : > { %v2275_v17 = vclamps-f32 %v2127_v35, 1.5 }
 0x292   : > { %v2132_v12 = vmul.f32 0.7, %v2274_v6 }
 0x293   : > { %v2133_v11 = vmul.f32 0.7, %v2275_v17 }
 0x295   : > { %v2136_v20 = vcombine.low %v2132_v12, %v2133_v11 }
 0x297   : > { %v2143_v62 = vrot.slane %v2136_v20, %v3959_v44 }
 0x299   : > { %v2150_v24 = vrot.slane %v2143_v62, %v3959_v44 }
 0x29b   : > { %2156 = vst.msk [vmem:[%s205_s7] sm:$0x3] %vm2154_vm5, %v2150_v24 }
 0x29c   : > { %2569 = shalt.err (!%p2566_p2)
}
 0x29d   : > { %s2570_s22 = scalar_lea.hbm %s3832_s11, 32  ;;  %s2574_s28 = scalar_lea.hbm %s3878_s4, 64 }
 0x29e   : > { %p2571_p3 = scmp.ne.s32.totalorder %s3832_s11, %s2570_s22  ;;  %p2575_p8 = scmp.lt.u32.totalorder %s3832_s11, %s3878_s4 }
 0x29f   : > { %p2576_p9 = scmp.lt.u32.totalorder %s2574_s28, %s2570_s22  ;;  %p2578_p11 = scmp.lt.u32.totalorder %s2570_s22, %s3832_s11 }
 0x2a0   : > { %p2572_p4 = pnand %p2571_p3, %p2692_p5 }
 0x2a1   : > { %p2577_p10 = por %p2576_p9, %p2575_p8 }
 0x2a2   : > { %p2573_p7 = pneg %p2572_p4 }
 0x2a3   : > { %p2579_p12 = por %p2578_p11, %p2577_p10 }
 0x2a5   : > { %p2580_p13 = pnand %p2579_p12, %p2573_p7 }
 0x2a7   : > { %2583 = shalt.err (!%p2580_p13)
}
 0x2a8   : > { %2488 = dma.vmem_to_hbm [thread:$0]  (%p2692_p5), %s3834_s8, 32, %s3832_s11, %s2158_s19  }
 0x2a9 PF: > { %p2500_p0 = scmp.ge.s32.totalorder %s2622_s18, 2  ;;  %s2184_s5 = sand.u32 1, %s2610_s15  }
 0x2aa   : > { %s2185_s6 = scalar_lea.sflag [#allocation3], %s2184_s5 }
 0x2ab   : > { %p2495_p1 = pnand %p2500_p0, %p2696_p6 }
 0x2ad   : > { %2605 = dma.done.wait (!%p2495_p1), %s2185_s6, 32  }
 0x2ae   : > { %2607 = vsyncadd (!%p2495_p1), %s2185_s6, 4294967264  ;;  %p15_p2 = scmp.ge.s32.totalorder %s2679_s21, 4   ;;  %s3965_s15 = smov %s2614_s16 }
 0x2af   : > { %s3966_s16 = smov %s2618_s17  ;;  %s3967_s17 = smov %s2690_s24 }
 0x2b0   : > { %s3968_s18 = smov %s2679_s21  ;;  %17 = sbr.rel (!%p15_p2) target bundleno = 4 (0x4), region = 78 }
 0x2b7   :  { %2190 = vsyncpa [#allocation3], 1 }
 0x2b8   :  { %2192 = vsyncpa [#allocation3 + $0x1], 1 }
 0x2b9   :  { %2193 = vsyncpa [#allocation4], 1 }
 0x2ba   :  { %2195 = vsyncpa [#allocation4 + $0x1], 1 }

</bundles_post_ra>
